<compile_context>
chip_gen: v7x
topology: tpu7x:2x2x1
jax: 0.10.0
libtpu: 0.0.40
codegen_flags: <defaults>
</compile_context>

<pallas_src>
import math
from functools import partial

import jax
import jax.numpy as jnp
from jax.experimental import pallas as pl
from jax.experimental.pallas import tpu as pltpu

# ---------------- config (config.attn == 'orig') ---------------------------------
D_MODEL = 32
N_HEADS = 4
D_HEAD = D_MODEL // N_HEADS
D_FF = 64
N_LAYERS = 2
VOCAB = 50
V_PAD = 128          # lane-dense padded vocab for generator/CE kernel
PAD_ID = 0
LN_EPS = 1e-6
NEG_INF = -1e9
# TODO(synk): `apply_proj=True` attention variant ('half'/'proj' configs) is not
# defined in the provided source; only the config.attn == 'orig' path is implemented.


# ---------------- in-kernel helpers -----------------------------------------------
def _ln(x, g, b):
    mean = jnp.mean(x, axis=-1, keepdims=True)
    var = jnp.mean(jnp.square(x - mean), axis=-1, keepdims=True)
    return (x - mean) * jax.lax.rsqrt(var + LN_EPS) * g + b


# ---------------- fused attention sublayer kernel ----------------------------------
def _attn_sublayer_kernel(*refs, self_attn, scale, n_heads, d_head):
    if self_attn:
        (xq_ref, bias_ref, g_ref, b_ref,
         wqkv_ref, bqkv_ref, wo_ref, bo_ref, o_ref) = refs
    else:
        (xq_ref, kv_ref, bias_ref, g_ref, b_ref,
         wqkv_ref, bqkv_ref, wo_ref, bo_ref, o_ref) = refs

    xq = xq_ref[0].astype(jnp.float32)                        # (Sq, D)
    d = xq.shape[-1]
    nq = _ln(xq, g_ref[...], b_ref[...])                      # (Sq, D)

    wqkv = wqkv_ref[...]                                      # (D, 3D)
    bqkv = bqkv_ref[...]                                      # (1, 3D)

    if self_attn:
        # single packed MXU pass for Q, K, V
        qkv = jnp.dot(nq, wqkv, preferred_element_type=jnp.float32) + bqkv
        q = qkv[:, :d]
        k = qkv[:, d:2 * d]
        v = qkv[:, 2 * d:]
    else:
        # query from normed x, key/value from (un-normed) encoder memory
        nkv = kv_ref[0].astype(jnp.float32)                   # (Skv, D)
        q = jnp.dot(nq, wqkv[:, :d], preferred_element_type=jnp.float32) + bqkv[:, :d]
        kvm = jnp.dot(nkv, wqkv[:, d:], preferred_element_type=jnp.float32) + bqkv[:, d:]
        k = kvm[:, :d]
        v = kvm[:, d:]

    bias = bias_ref[0]                                        # (Sq, Skv), shared by heads

    head_outs = []
    for h in range(n_heads):                                  # static unrolled loop
        sl = slice(h * d_head, (h + 1) * d_head)
        qh, kh, vh = q[:, sl], k[:, sl], v[:, sl]
        s = jnp.dot(qh, kh.T, preferred_element_type=jnp.float32) * scale + bias
        s = s - jnp.max(s, axis=-1, keepdims=True)
        p = jnp.exp(s)
        p = p * pl.reciprocal(jnp.sum(p, axis=-1, keepdims=True), approx=True)
        head_outs.append(jnp.dot(p, vh, preferred_element_type=jnp.float32))
    attn = jnp.concatenate(head_outs, axis=-1)                # (Sq, D)

    proj = jnp.dot(attn, wo_ref[...], preferred_element_type=jnp.float32) + bo_ref[...]
    o_ref[0] = (xq + proj).astype(o_ref.dtype)                # residual add


def attn_sublayer(x, kv, bias, ln_p, attn_p, *, self_attn):
    B, Sq, D = x.shape
    in_arrays = [x]
    in_specs = [pl.BlockSpec((1, Sq, D), lambda b: (b, 0, 0))]
    if self_attn:
        Skv = Sq
    else:
        Skv = kv.shape[1]
        in_arrays.append(kv)
        in_specs.append(pl.BlockSpec((1, Skv, D), lambda b: (b, 0, 0)))
    in_arrays += [
        bias,
        ln_p["g"].reshape(1, D), ln_p["b"].reshape(1, D),
        attn_p["wqkv"], attn_p["bqkv"].reshape(1, 3 * D),
        attn_p["wo"], attn_p["bo"].reshape(1, D),
    ]
    in_specs += [
        pl.BlockSpec((1, Sq, Skv), lambda b: (b, 0, 0)),
        pl.BlockSpec((1, D), lambda b: (0, 0)),
        pl.BlockSpec((1, D), lambda b: (0, 0)),
        pl.BlockSpec((D, 3 * D), lambda b: (0, 0)),
        pl.BlockSpec((1, 3 * D), lambda b: (0, 0)),
        pl.BlockSpec((D, D), lambda b: (0, 0)),
        pl.BlockSpec((1, D), lambda b: (0, 0)),
    ]
    return pl.pallas_call(
        partial(_attn_sublayer_kernel, self_attn=self_attn,
                scale=1.0 / math.sqrt(D_HEAD), n_heads=N_HEADS, d_head=D_HEAD),
        out_shape=jax.ShapeDtypeStruct((B, Sq, D), x.dtype),
        grid=(B,),
        in_specs=in_specs,
        out_specs=pl.BlockSpec((1, Sq, D), lambda b: (b, 0, 0)),
        compiler_params=pltpu.CompilerParams(dimension_semantics=("parallel",)),
    )(*in_arrays)


# ---------------- fused feed-forward sublayer kernel --------------------------------
def _ff_sublayer_kernel(x_ref, g_ref, b_ref, w1_ref, b1_ref, w2_ref, b2_ref, o_ref):
    x = x_ref[0].astype(jnp.float32)                          # (S, D)
    n = _ln(x, g_ref[...], b_ref[...])
    h = jnp.dot(n, w1_ref[...], preferred_element_type=jnp.float32) + b1_ref[...]
    h = jnp.maximum(h, 0.0)
    y = jnp.dot(h, w2_ref[...], preferred_element_type=jnp.float32) + b2_ref[...]
    o_ref[0] = (x + y).astype(o_ref.dtype)                    # residual add


def ff_sublayer(x, ln_p, ff1, ff2):
    B, S, D = x.shape
    return pl.pallas_call(
        _ff_sublayer_kernel,
        out_shape=jax.ShapeDtypeStruct((B, S, D), x.dtype),
        grid=(B,),
        in_specs=[
            pl.BlockSpec((1, S, D), lambda b: (b, 0, 0)),
            pl.BlockSpec((1, D), lambda b: (0, 0)),
            pl.BlockSpec((1, D), lambda b: (0, 0)),
            pl.BlockSpec((D, D_FF), lambda b: (0, 0)),
            pl.BlockSpec((1, D_FF), lambda b: (0, 0)),
            pl.BlockSpec((D_FF, D), lambda b: (0, 0)),
            pl.BlockSpec((1, D), lambda b: (0, 0)),
        ],
        out_specs=pl.BlockSpec((1, S, D), lambda b: (b, 0, 0)),
        compiler_params=pltpu.CompilerParams(dimension_semantics=("parallel",)),
    )(x, ln_p["g"].reshape(1, D), ln_p["b"].reshape(1, D),
      ff1["w"], ff1["b"].reshape(1, D_FF), ff2["w"], ff2["b"].reshape(1, D))


# ---------------- fused generator + cross-entropy kernel ----------------------------
def _gen_ce_kernel(x_ref, w_ref, b_ref, labels_ref, logits_ref, loss_ref):
    x = x_ref[...].astype(jnp.float32)                        # (M, D)
    # padded columns carry w=0, b=-1e9  ->  logit=-1e9, exp()=0 in the LSE
    logits = jnp.dot(x, w_ref[...], preferred_element_type=jnp.float32) + b_ref[...]
    logits_ref[...] = logits.astype(logits_ref.dtype)         # lane-dense (M, 128) store
    m = jnp.max(logits, axis=-1, keepdims=True)
    lse = jnp.log(jnp.sum(jnp.exp(logits - m), axis=-1, keepdims=True)) + m
    labels = labels_ref[...]                                  # (M, 1) int32
    onehot = jax.lax.broadcasted_iota(jnp.int32, logits.shape, 1) == labels
    picked = jnp.sum(jnp.where(onehot, logits, 0.0), axis=-1, keepdims=True)
    loss_ref[...] = jnp.mean(lse - picked).reshape(1, 1)


def generator_ce(x2d, w, b, labels):
    # matches nn.CrossEntropyLoss() default: mean NLL over all flattened tokens
    M, D = x2d.shape
    V = w.shape[1]
    w_pad = jnp.zeros((D, V_PAD), w.dtype).at[:, :V].set(w)
    b_pad = jnp.full((1, V_PAD), NEG_INF, jnp.float32).at[0, :V].set(b)
    logits_pad, loss = pl.pallas_call(
        _gen_ce_kernel,
        out_shape=(jax.ShapeDtypeStruct((M, V_PAD), jnp.float32),
                   jax.ShapeDtypeStruct((1, 1), jnp.float32)),
        grid=(1,),
        in_specs=[
            pl.BlockSpec((M, D), lambda i: (0, 0)),
            pl.BlockSpec((D, V_PAD), lambda i: (0, 0)),
            pl.BlockSpec((1, V_PAD), lambda i: (0, 0)),
            pl.BlockSpec((M, 1), lambda i: (0, 0)),
        ],
        out_specs=(pl.BlockSpec((M, V_PAD), lambda i: (0, 0)),
                   pl.BlockSpec((1, 1), lambda i: (0, 0))),
    )(x2d, w_pad, b_pad, labels.reshape(M, 1).astype(jnp.int32))
    return logits_pad, loss[0, 0]


# ---------------- model glue (plain JAX) -------------------------------------------
# TODO(synk): embedding gather, sinusoidal PE and mask construction remain in JAX
# (no rectangular-tile Pallas win at these sizes).
def positional_encoding(max_len, d):
    pos = jnp.arange(max_len, dtype=jnp.float32)[:, None]
    div = jnp.exp(jnp.arange(0, d, 2, dtype=jnp.float32) * (-math.log(10000.0) / d))
    pe = jnp.zeros((max_len, d), jnp.float32)
    pe = pe.at[:, 0::2].set(jnp.sin(pos * div))
    pe = pe.at[:, 1::2].set(jnp.cos(pos * div))
    return pe


def init_params(key):
    keys = iter(jax.random.split(key, 64))

    def dense(d_in, d_out):
        return {
            "w": jax.random.normal(next(keys), (d_in, d_out), jnp.float32) * 0.02,
            "b": jnp.zeros((d_out,), jnp.float32),
        }

    def ln():
        return {"g": jnp.ones((D_MODEL,), jnp.float32),
                "b": jnp.zeros((D_MODEL,), jnp.float32)}

    def attn_block():
        # packed Wq|Wk|Wv -> (D, 3D), single MXU pass for self-attention
        return {
            "wqkv": jax.random.normal(next(keys), (D_MODEL, 3 * D_MODEL),
                                      jnp.float32) * 0.02,
            "bqkv": jnp.zeros((3 * D_MODEL,), jnp.float32),
            "wo": jax.random.normal(next(keys), (D_MODEL, D_MODEL), jnp.float32) * 0.02,
            "bo": jnp.zeros((D_MODEL,), jnp.float32),
        }

    def enc_layer():
        return {"attn": attn_block(), "ln1": ln(), "ln2": ln(),
                "ff1": dense(D_MODEL, D_FF), "ff2": dense(D_FF, D_MODEL)}

    def dec_layer():
        return {"self_attn": attn_block(), "src_attn": attn_block(),
                "ln1": ln(), "ln2": ln(), "ln3": ln(),
                "ff1": dense(D_MODEL, D_FF), "ff2": dense(D_FF, D_MODEL)}

    return {
        "enc_emb": jax.random.normal(next(keys), (VOCAB, D_MODEL), jnp.float32) * 0.02,
        "dec_emb": jax.random.normal(next(keys), (VOCAB, D_MODEL), jnp.float32) * 0.02,
        "enc_layers": [enc_layer() for _ in range(N_LAYERS)],
        "dec_layers": [dec_layer() for _ in range(N_LAYERS)],
        "generator": dense(D_MODEL, VOCAB),
    }


def embed(tokens, table, pe):
    return jnp.take(table, tokens, axis=0) * math.sqrt(D_MODEL) + pe[: tokens.shape[1]]


def encoder(x_tok, e_bias, params, pe):
    x = embed(x_tok, params["enc_emb"], pe)
    for lp in params["enc_layers"]:
        x = attn_sublayer(x, None, e_bias, lp["ln1"], lp["attn"], self_attn=True)
        x = ff_sublayer(x, lp["ln2"], lp["ff1"], lp["ff2"])
    return x


def decoder(y_tok, memory, cross_bias, d_bias, params, pe):
    x = embed(y_tok, params["dec_emb"], pe)
    for lp in params["dec_layers"]:
        x = attn_sublayer(x, None, d_bias, lp["ln1"], lp["self_attn"], self_attn=True)
        x = attn_sublayer(x, memory, cross_bias, lp["ln2"], lp["src_attn"],
                          self_attn=False)
        x = ff_sublayer(x, lp["ln3"], lp["ff1"], lp["ff2"])
    return x


def forward(params, pe, x_tok, y_tok):
    # shift_y
    y_in, label = y_tok[:, :-1], y_tok[:, 1:]
    B, Sx = x_tok.shape
    Sy = y_in.shape[1]

    # pad_mask / dec_mask -> per-batch additive biases (shared across heads in-kernel)
    e_keep = (x_tok != PAD_ID)                                          # (B, Sx)
    e_bias_row = jnp.where(e_keep[:, None, :], 0.0, NEG_INF).astype(jnp.float32)
    enc_self_bias = jnp.broadcast_to(e_bias_row, (B, Sx, Sx))           # (B, Sx, Sx)
    cross_bias = jnp.broadcast_to(e_bias_row, (B, Sy, Sx))              # (B, Sy, Sx)
    sub = jnp.tril(jnp.ones((Sy, Sy), dtype=bool))
    d_keep = (y_in != PAD_ID)[:, None, :] & sub[None]                   # (B, Sy, Sy)
    dec_self_bias = jnp.where(d_keep, 0.0, NEG_INF).astype(jnp.float32)

    memory = encoder(x_tok, enc_self_bias, params, pe)
    dec_out = decoder(y_in, memory, cross_bias, dec_self_bias, params, pe)

    logits_pad, loss = generator_ce(dec_out.reshape(-1, D_MODEL),
                                    params["generator"]["w"],
                                    params["generator"]["b"],
                                    label.reshape(-1))
    logits = logits_pad[:, :VOCAB].reshape(B, Sy, VOCAB)
    return logits, loss


# ---------------- main --------------------------------------------------------------
if __name__ == "__main__":
    key = jax.random.PRNGKey(0)
    pkey, xkey, ykey = jax.random.split(key, 3)
    params = init_params(pkey)
    pe = positional_encoding(64, D_MODEL)

    B, Sx, Sy_full = 2, 8, 9
    x_tok = jax.random.randint(xkey, (B, Sx), 1, VOCAB)
    y_tok = jax.random.randint(ykey, (B, Sy_full), 1, VOCAB)
    x_tok = x_tok.at[1, -2:].set(PAD_ID)   # exercise the padding mask

    logits, loss = jax.jit(forward)(params, pe, x_tok, y_tok)
    jax.block_until_ready((logits, loss))
    assert logits.shape == (B, Sy_full - 1, VOCAB)
    assert jnp.isfinite(loss)
    print("KERNEL_OK")
</pallas_src>

<mosaic_0001>
module attributes {stable_mosaic.version = 11 : i64} {
  func.func @_ff_sublayer_kernel(%arg0: i32, %arg1: memref<1x8x32xf32, #tpu.memory_space<vmem>>, %arg2: memref<1x32xf32, #tpu.memory_space<vmem>>, %arg3: memref<1x32xf32, #tpu.memory_space<vmem>>, %arg4: memref<32x64xf32, #tpu.memory_space<vmem>>, %arg5: memref<1x64xf32, #tpu.memory_space<vmem>>, %arg6: memref<64x32xf32, #tpu.memory_space<vmem>>, %arg7: memref<1x32xf32, #tpu.memory_space<vmem>>, %arg8: memref<1x8x32xf32, #tpu.memory_space<vmem>>) attributes {dimension_semantics = [#tpu.dimension_semantics<parallel>], iteration_bounds = array<i64: 2>, scalar_prefetch = 0 : i64, scratch_operands = 0 : i64, tpu.core_type = #tpu.core_type<tc>, window_params = [{transform_indices = @transform_0, window_bounds = array<i64: 1, 8, 32>}, {pipeline_mode = #tpu.pipeline_mode<synchronous>, transform_indices = @transform_1, window_bounds = array<i64: 1, 32>}, {pipeline_mode = #tpu.pipeline_mode<synchronous>, transform_indices = @transform_2, window_bounds = array<i64: 1, 32>}, {pipeline_mode = #tpu.pipeline_mode<synchronous>, transform_indices = @transform_3, window_bounds = array<i64: 32, 64>}, {pipeline_mode = #tpu.pipeline_mode<synchronous>, transform_indices = @transform_4, window_bounds = array<i64: 1, 64>}, {pipeline_mode = #tpu.pipeline_mode<synchronous>, transform_indices = @transform_5, window_bounds = array<i64: 64, 32>}, {pipeline_mode = #tpu.pipeline_mode<synchronous>, transform_indices = @transform_6, window_bounds = array<i64: 1, 32>}, {transform_indices = @transform_7, window_bounds = array<i64: 1, 8, 32>}]} {
    %c0 = arith.constant 0 : index
    %c0_0 = arith.constant 0 : index
    %c0_1 = arith.constant 0 : index
    %0 = vector.load %arg1[%c0, %c0_0, %c0_1] : memref<1x8x32xf32, #tpu.memory_space<vmem>>, vector<1x8x32xf32>
    %1 = vector.shape_cast %0 : vector<1x8x32xf32> to vector<8x32xf32>
    %c0_2 = arith.constant 0 : index
    %c0_3 = arith.constant 0 : index
    %2 = vector.load %arg2[%c0_2, %c0_3] : memref<1x32xf32, #tpu.memory_space<vmem>>, vector<1x32xf32>
    %c0_4 = arith.constant 0 : index
    %c0_5 = arith.constant 0 : index
    %3 = vector.load %arg3[%c0_4, %c0_5] : memref<1x32xf32, #tpu.memory_space<vmem>>, vector<1x32xf32>
    %cst = arith.constant dense<0.000000e+00> : vector<8xf32>
    %4 = vector.multi_reduction <add>, %1, %cst [1] : vector<8x32xf32> to vector<8xf32>
    %5 = vector.shape_cast %4 : vector<8xf32> to vector<8x1xf32>
    %cst_6 = arith.constant 3.200000e+01 : f32
    %6 = vector.broadcast %cst_6 : f32 to vector<8x1xf32>
    %7 = arith.divf %5, %6 : vector<8x1xf32>
    %8 = vector.broadcast %7 : vector<8x1xf32> to vector<8x32xf32>
    %9 = arith.subf %1, %8 : vector<8x32xf32>
    %10 = arith.mulf %9, %9 : vector<8x32xf32>
    %cst_7 = arith.constant dense<0.000000e+00> : vector<8xf32>
    %11 = vector.multi_reduction <add>, %10, %cst_7 [1] : vector<8x32xf32> to vector<8xf32>
    %12 = vector.shape_cast %11 : vector<8xf32> to vector<8x1xf32>
    %cst_8 = arith.constant 3.200000e+01 : f32
    %13 = vector.broadcast %cst_8 : f32 to vector<8x1xf32>
    %14 = arith.divf %12, %13 : vector<8x1xf32>
    %15 = vector.broadcast %7 : vector<8x1xf32> to vector<8x32xf32>
    %16 = arith.subf %1, %15 : vector<8x32xf32>
    %cst_9 = arith.constant 9.99999997E-7 : f32
    %17 = vector.broadcast %cst_9 : f32 to vector<8x1xf32>
    %18 = arith.addf %14, %17 : vector<8x1xf32>
    %19 = math.rsqrt %18 : vector<8x1xf32>
    %20 = vector.broadcast %19 : vector<8x1xf32> to vector<8x32xf32>
    %21 = arith.mulf %16, %20 : vector<8x32xf32>
    %22 = vector.broadcast %2 : vector<1x32xf32> to vector<8x32xf32>
    %23 = arith.mulf %21, %22 : vector<8x32xf32>
    %24 = vector.broadcast %3 : vector<1x32xf32> to vector<8x32xf32>
    %25 = arith.addf %23, %24 : vector<8x32xf32>
    %c0_10 = arith.constant 0 : index
    %c0_11 = arith.constant 0 : index
    %26 = vector.load %arg4[%c0_10, %c0_11] : memref<32x64xf32, #tpu.memory_space<vmem>>, vector<32x64xf32>
    %cst_12 = arith.constant dense<0.000000e+00> : vector<8x64xf32>
    %27 = tpu.matmul %25, %26, %cst_12 {dimension_numbers = #tpu.dot_dimension_numbers<[1], [0], [0], [1], [0, 0, 1, 1], [], []>} : vector<8x32xf32>, vector<32x64xf32>, vector<8x64xf32> -> vector<8x64xf32>
    %c0_13 = arith.constant 0 : index
    %c0_14 = arith.constant 0 : index
    %28 = vector.load %arg5[%c0_13, %c0_14] : memref<1x64xf32, #tpu.memory_space<vmem>>, vector<1x64xf32>
    %29 = vector.broadcast %28 : vector<1x64xf32> to vector<8x64xf32>
    %30 = arith.addf %27, %29 : vector<8x64xf32>
    %cst_15 = arith.constant 0.000000e+00 : f32
    %31 = vector.broadcast %cst_15 : f32 to vector<8x64xf32>
    %32 = arith.maximumf %30, %31 : vector<8x64xf32>
    %c0_16 = arith.constant 0 : index
    %c0_17 = arith.constant 0 : index
    %33 = vector.load %arg6[%c0_16, %c0_17] : memref<64x32xf32, #tpu.memory_space<vmem>>, vector<64x32xf32>
    %cst_18 = arith.constant dense<0.000000e+00> : vector<8x32xf32>
    %34 = tpu.matmul %32, %33, %cst_18 {dimension_numbers = #tpu.dot_dimension_numbers<[1], [0], [0], [1], [0, 0, 1, 1], [], []>} : vector<8x64xf32>, vector<64x32xf32>, vector<8x32xf32> -> vector<8x32xf32>
    %c0_19 = arith.constant 0 : index
    %c0_20 = arith.constant 0 : index
    %35 = vector.load %arg7[%c0_19, %c0_20] : memref<1x32xf32, #tpu.memory_space<vmem>>, vector<1x32xf32>
    %36 = vector.broadcast %35 : vector<1x32xf32> to vector<8x32xf32>
    %37 = arith.addf %34, %36 : vector<8x32xf32>
    %38 = arith.addf %1, %37 : vector<8x32xf32>
    %c0_21 = arith.constant 0 : index
    %c0_22 = arith.constant 0 : index
    %c0_23 = arith.constant 0 : index
    %39 = vector.load %arg8[%c0_21, %c0_22, %c0_23] : memref<1x8x32xf32, #tpu.memory_space<vmem>>, vector<1x8x32xf32>
    %40 = vector.shape_cast %39 : vector<1x8x32xf32> to vector<8x32xf32>
    %41 = vector.shape_cast %38 : vector<8x32xf32> to vector<1x8x32xf32>
    tpu.vector_store %arg8[%c0_21, %c0_22, %c0_23], %41 {strides = array<i32>} : memref<1x8x32xf32, #tpu.memory_space<vmem>>, vector<1x8x32xf32>,
    return
  }
  func.func @transform_0(%arg0: i32) -> (i32, i32, i32) {
    %c0_i32 = arith.constant 0 : i32
    %c0_i32_0 = arith.constant 0 : i32
    %c0_i32_1 = arith.constant 0 : i32
    return %arg0, %c0_i32, %c0_i32_0 : i32, i32, i32
  }
  func.func @transform_1(%arg0: i32) -> (i32, i32) {
    %c0_i32 = arith.constant 0 : i32
    %c0_i32_0 = arith.constant 0 : i32
    %c0_i32_1 = arith.constant 0 : i32
    return %c0_i32, %c0_i32_0 : i32, i32
  }
  func.func @transform_2(%arg0: i32) -> (i32, i32) {
    %c0_i32 = arith.constant 0 : i32
    %c0_i32_0 = arith.constant 0 : i32
    %c0_i32_1 = arith.constant 0 : i32
    return %c0_i32, %c0_i32_0 : i32, i32
  }
  func.func @transform_3(%arg0: i32) -> (i32, i32) {
    %c0_i32 = arith.constant 0 : i32
    %c0_i32_0 = arith.constant 0 : i32
    %c0_i32_1 = arith.constant 0 : i32
    return %c0_i32, %c0_i32_0 : i32, i32
  }
  func.func @transform_4(%arg0: i32) -> (i32, i32) {
    %c0_i32 = arith.constant 0 : i32
    %c0_i32_0 = arith.constant 0 : i32
    %c0_i32_1 = arith.constant 0 : i32
    return %c0_i32, %c0_i32_0 : i32, i32
  }
  func.func @transform_5(%arg0: i32) -> (i32, i32) {
    %c0_i32 = arith.constant 0 : i32
    %c0_i32_0 = arith.constant 0 : i32
    %c0_i32_1 = arith.constant 0 : i32
    return %c0_i32, %c0_i32_0 : i32, i32
  }
  func.func @transform_6(%arg0: i32) -> (i32, i32) {
    %c0_i32 = arith.constant 0 : i32
    %c0_i32_0 = arith.constant 0 : i32
    %c0_i32_1 = arith.constant 0 : i32
    return %c0_i32, %c0_i32_0 : i32, i32
  }
  func.func @transform_7(%arg0: i32) -> (i32, i32, i32) {
    %c0_i32 = arith.constant 0 : i32
    %c0_i32_0 = arith.constant 0 : i32
    %c0_i32_1 = arith.constant 0 : i32
    return %arg0, %c0_i32, %c0_i32_0 : i32, i32, i32
  }
}

module attributes {stable_mosaic.version = 11 : i64} {
  func.func @_attn_sublayer_kernel(%arg0: i32, %arg1: memref<1x8x32xf32, #tpu.memory_space<vmem>>, %arg2: memref<1x8x8xf32, #tpu.memory_space<vmem>>, %arg3: memref<1x32xf32, #tpu.memory_space<vmem>>, %arg4: memref<1x32xf32, #tpu.memory_space<vmem>>, %arg5: memref<32x96xf32, #tpu.memory_space<vmem>>, %arg6: memref<1x96xf32, #tpu.memory_space<vmem>>, %arg7: memref<32x32xf32, #tpu.memory_space<vmem>>, %arg8: memref<1x32xf32, #tpu.memory_space<vmem>>, %arg9: memref<1x8x32xf32, #tpu.memory_space<vmem>>) attributes {dimension_semantics = [#tpu.dimension_semantics<parallel>], iteration_bounds = array<i64: 2>, scalar_prefetch = 0 : i64, scratch_operands = 0 : i64, tpu.core_type = #tpu.core_type<tc>, window_params = [{transform_indices = @transform_0, window_bounds = array<i64: 1, 8, 32>}, {transform_indices = @transform_1, window_bounds = array<i64: 1, 8, 8>}, {pipeline_mode = #tpu.pipeline_mode<synchronous>, transform_indices = @transform_2, window_bounds = array<i64: 1, 32>}, {pipeline_mode = #tpu.pipeline_mode<synchronous>, transform_indices = @transform_3, window_bounds = array<i64: 1, 32>}, {pipeline_mode = #tpu.pipeline_mode<synchronous>, transform_indices = @transform_4, window_bounds = array<i64: 32, 96>}, {pipeline_mode = #tpu.pipeline_mode<synchronous>, transform_indices = @transform_5, window_bounds = array<i64: 1, 96>}, {pipeline_mode = #tpu.pipeline_mode<synchronous>, transform_indices = @transform_6, window_bounds = array<i64: 32, 32>}, {pipeline_mode = #tpu.pipeline_mode<synchronous>, transform_indices = @transform_7, window_bounds = array<i64: 1, 32>}, {transform_indices = @transform_8, window_bounds = array<i64: 1, 8, 32>}]} {
    %c0 = arith.constant 0 : index
    %c0_0 = arith.constant 0 : index
    %c0_1 = arith.constant 0 : index
    %0 = vector.load %arg1[%c0, %c0_0, %c0_1] : memref<1x8x32xf32, #tpu.memory_space<vmem>>, vector<1x8x32xf32>
    %1 = vector.shape_cast %0 : vector<1x8x32xf32> to vector<8x32xf32>
    %c0_2 = arith.constant 0 : index
    %c0_3 = arith.constant 0 : index
    %2 = vector.load %arg3[%c0_2, %c0_3] : memref<1x32xf32, #tpu.memory_space<vmem>>, vector<1x32xf32>
    %c0_4 = arith.constant 0 : index
    %c0_5 = arith.constant 0 : index
    %3 = vector.load %arg4[%c0_4, %c0_5] : memref<1x32xf32, #tpu.memory_space<vmem>>, vector<1x32xf32>
    %cst = arith.constant dense<0.000000e+00> : vector<8xf32>
    %4 = vector.multi_reduction <add>, %1, %cst [1] : vector<8x32xf32> to vector<8xf32>
    %5 = vector.shape_cast %4 : vector<8xf32> to vector<8x1xf32>
    %cst_6 = arith.constant 3.200000e+01 : f32
    %6 = vector.broadcast %cst_6 : f32 to vector<8x1xf32>
    %7 = arith.divf %5, %6 : vector<8x1xf32>
    %8 = vector.broadcast %7 : vector<8x1xf32> to vector<8x32xf32>
    %9 = arith.subf %1, %8 : vector<8x32xf32>
    %10 = arith.mulf %9, %9 : vector<8x32xf32>
    %cst_7 = arith.constant dense<0.000000e+00> : vector<8xf32>
    %11 = vector.multi_reduction <add>, %10, %cst_7 [1] : vector<8x32xf32> to vector<8xf32>
    %12 = vector.shape_cast %11 : vector<8xf32> to vector<8x1xf32>
    %cst_8 = arith.constant 3.200000e+01 : f32
    %13 = vector.broadcast %cst_8 : f32 to vector<8x1xf32>
    %14 = arith.divf %12, %13 : vector<8x1xf32>
    %15 = vector.broadcast %7 : vector<8x1xf32> to vector<8x32xf32>
    %16 = arith.subf %1, %15 : vector<8x32xf32>
    %cst_9 = arith.constant 9.99999997E-7 : f32
    %17 = vector.broadcast %cst_9 : f32 to vector<8x1xf32>
    %18 = arith.addf %14, %17 : vector<8x1xf32>
    %19 = math.rsqrt %18 : vector<8x1xf32>
    %20 = vector.broadcast %19 : vector<8x1xf32> to vector<8x32xf32>
    %21 = arith.mulf %16, %20 : vector<8x32xf32>
    %22 = vector.broadcast %2 : vector<1x32xf32> to vector<8x32xf32>
    %23 = arith.mulf %21, %22 : vector<8x32xf32>
    %24 = vector.broadcast %3 : vector<1x32xf32> to vector<8x32xf32>
    %25 = arith.addf %23, %24 : vector<8x32xf32>
    %c0_10 = arith.constant 0 : index
    %c0_11 = arith.constant 0 : index
    %26 = vector.load %arg5[%c0_10, %c0_11] : memref<32x96xf32, #tpu.memory_space<vmem>>, vector<32x96xf32>
    %c0_12 = arith.constant 0 : index
    %c0_13 = arith.constant 0 : index
    %27 = vector.load %arg6[%c0_12, %c0_13] : memref<1x96xf32, #tpu.memory_space<vmem>>, vector<1x96xf32>
    %cst_14 = arith.constant dense<0.000000e+00> : vector<8x96xf32>
    %28 = tpu.matmul %25, %26, %cst_14 {dimension_numbers = #tpu.dot_dimension_numbers<[1], [0], [0], [1], [0, 0, 1, 1], [], []>} : vector<8x32xf32>, vector<32x96xf32>, vector<8x96xf32> -> vector<8x96xf32>
    %29 = vector.broadcast %27 : vector<1x96xf32> to vector<8x96xf32>
    %30 = arith.addf %28, %29 : vector<8x96xf32>
    %31 = vector.extract_strided_slice %30 {offsets = [0, 0], sizes = [8, 32], strides = [1, 1]} : vector<8x96xf32> to vector<8x32xf32>
    %32 = vector.extract_strided_slice %30 {offsets = [0, 32], sizes = [8, 32], strides = [1, 1]} : vector<8x96xf32> to vector<8x32xf32>
    %33 = vector.extract_strided_slice %30 {offsets = [0, 64], sizes = [8, 32], strides = [1, 1]} : vector<8x96xf32> to vector<8x32xf32>
    %c0_15 = arith.constant 0 : index
    %c0_16 = arith.constant 0 : index
    %c0_17 = arith.constant 0 : index
    %34 = vector.load %arg2[%c0_15, %c0_16, %c0_17] : memref<1x8x8xf32, #tpu.memory_space<vmem>>, vector<1x8x8xf32>
    %35 = vector.shape_cast %34 : vector<1x8x8xf32> to vector<8x8xf32>
    %36 = vector.extract_strided_slice %31 {offsets = [0, 0], sizes = [8, 8], strides = [1, 1]} : vector<8x32xf32> to vector<8x8xf32>
    %37 = vector.extract_strided_slice %32 {offsets = [0, 0], sizes = [8, 8], strides = [1, 1]} : vector<8x32xf32> to vector<8x8xf32>
    %38 = vector.extract_strided_slice %33 {offsets = [0, 0], sizes = [8, 8], strides = [1, 1]} : vector<8x32xf32> to vector<8x8xf32>
    %39 = tpu.transpose %37, [1, 0] : vector<8x8xf32> -> vector<8x8xf32>
    %cst_18 = arith.constant dense<0.000000e+00> : vector<8x8xf32>
    %40 = tpu.matmul %36, %39, %cst_18 {dimension_numbers = #tpu.dot_dimension_numbers<[1], [0], [0], [1], [0, 0, 1, 1], [], []>} : vector<8x8xf32>, vector<8x8xf32>, vector<8x8xf32> -> vector<8x8xf32>
    %cst_19 = arith.constant 0.353553385 : f32
    %41 = vector.broadcast %cst_19 : f32 to vector<8x8xf32>
    %42 = arith.mulf %40, %41 : vector<8x8xf32>
    %43 = arith.addf %42, %35 : vector<8x8xf32>
    %cst_20 = arith.constant dense<0xFF800000> : vector<8xf32>
    %44 = vector.multi_reduction <maximumf>, %43, %cst_20 [1] : vector<8x8xf32> to vector<8xf32>
    %45 = vector.shape_cast %44 : vector<8xf32> to vector<8x1xf32>
    %46 = vector.broadcast %45 : vector<8x1xf32> to vector<8x8xf32>
    %47 = arith.subf %43, %46 : vector<8x8xf32>
    %48 = math.exp %47 : vector<8x8xf32>
    %cst_21 = arith.constant dense<0.000000e+00> : vector<8xf32>
    %49 = vector.multi_reduction <add>, %48, %cst_21 [1] : vector<8x8xf32> to vector<8xf32>
    %50 = vector.shape_cast %49 : vector<8xf32> to vector<8x1xf32>
    %51 = tpu.reciprocal %50 {approx = true} : vector<8x1xf32> -> vector<8x1xf32>
    %52 = vector.broadcast %51 : vector<8x1xf32> to vector<8x8xf32>
    %53 = arith.mulf %48, %52 : vector<8x8xf32>
    %cst_22 = arith.constant dense<0.000000e+00> : vector<8x8xf32>
    %54 = tpu.matmul %53, %38, %cst_22 {dimension_numbers = #tpu.dot_dimension_numbers<[1], [0], [0], [1], [0, 0, 1, 1], [], []>} : vector<8x8xf32>, vector<8x8xf32>, vector<8x8xf32> -> vector<8x8xf32>
    %55 = vector.extract_strided_slice %31 {offsets = [0, 8], sizes = [8, 8], strides = [1, 1]} : vector<8x32xf32> to vector<8x8xf32>
    %56 = vector.extract_strided_slice %32 {offsets = [0, 8], sizes = [8, 8], strides = [1, 1]} : vector<8x32xf32> to vector<8x8xf32>
    %57 = vector.extract_strided_slice %33 {offsets = [0, 8], sizes = [8, 8], strides = [1, 1]} : vector<8x32xf32> to vector<8x8xf32>
    %58 = tpu.transpose %56, [1, 0] : vector<8x8xf32> -> vector<8x8xf32>
    %cst_23 = arith.constant dense<0.000000e+00> : vector<8x8xf32>
    %59 = tpu.matmul %55, %58, %cst_23 {dimension_numbers = #tpu.dot_dimension_numbers<[1], [0], [0], [1], [0, 0, 1, 1], [], []>} : vector<8x8xf32>, vector<8x8xf32>, vector<8x8xf32> -> vector<8x8xf32>
    %cst_24 = arith.constant 0.353553385 : f32
    %60 = vector.broadcast %cst_24 : f32 to vector<8x8xf32>
    %61 = arith.mulf %59, %60 : vector<8x8xf32>
    %62 = arith.addf %61, %35 : vector<8x8xf32>
    %cst_25 = arith.constant dense<0xFF800000> : vector<8xf32>
    %63 = vector.multi_reduction <maximumf>, %62, %cst_25 [1] : vector<8x8xf32> to vector<8xf32>
    %64 = vector.shape_cast %63 : vector<8xf32> to vector<8x1xf32>
    %65 = vector.broadcast %64 : vector<8x1xf32> to vector<8x8xf32>
    %66 = arith.subf %62, %65 : vector<8x8xf32>
    %67 = math.exp %66 : vector<8x8xf32>
    %cst_26 = arith.constant dense<0.000000e+00> : vector<8xf32>
    %68 = vector.multi_reduction <add>, %67, %cst_26 [1] : vector<8x8xf32> to vector<8xf32>
    %69 = vector.shape_cast %68 : vector<8xf32> to vector<8x1xf32>
    %70 = tpu.reciprocal %69 {approx = true} : vector<8x1xf32> -> vector<8x1xf32>
    %71 = vector.broadcast %70 : vector<8x1xf32> to vector<8x8xf32>
    %72 = arith.mulf %67, %71 : vector<8x8xf32>
    %cst_27 = arith.constant dense<0.000000e+00> : vector<8x8xf32>
    %73 = tpu.matmul %72, %57, %cst_27 {dimension_numbers = #tpu.dot_dimension_numbers<[1], [0], [0], [1], [0, 0, 1, 1], [], []>} : vector<8x8xf32>, vector<8x8xf32>, vector<8x8xf32> -> vector<8x8xf32>
    %74 = vector.extract_strided_slice %31 {offsets = [0, 16], sizes = [8, 8], strides = [1, 1]} : vector<8x32xf32> to vector<8x8xf32>
    %75 = vector.extract_strided_slice %32 {offsets = [0, 16], sizes = [8, 8], strides = [1, 1]} : vector<8x32xf32> to vector<8x8xf32>
    %76 = vector.extract_strided_slice %33 {offsets = [0, 16], sizes = [8, 8], strides = [1, 1]} : vector<8x32xf32> to vector<8x8xf32>
    %77 = tpu.transpose %75, [1, 0] : vector<8x8xf32> -> vector<8x8xf32>
    %cst_28 = arith.constant dense<0.000000e+00> : vector<8x8xf32>
    %78 = tpu.matmul %74, %77, %cst_28 {dimension_numbers = #tpu.dot_dimension_numbers<[1], [0], [0], [1], [0, 0, 1, 1], [], []>} : vector<8x8xf32>, vector<8x8xf32>, vector<8x8xf32> -> vector<8x8xf32>
    %cst_29 = arith.constant 0.353553385 : f32
    %79 = vector.broadcast %cst_29 : f32 to vector<8x8xf32>
    %80 = arith.mulf %78, %79 : vector<8x8xf32>
    %81 = arith.addf %80, %35 : vector<8x8xf32>
    %cst_30 = arith.constant dense<0xFF800000> : vector<8xf32>
    %82 = vector.multi_reduction <maximumf>, %81, %cst_30 [1] : vector<8x8xf32> to vector<8xf32>
    %83 = vector.shape_cast %82 : vector<8xf32> to vector<8x1xf32>
    %84 = vector.broadcast %83 : vector<8x1xf32> to vector<8x8xf32>
    %85 = arith.subf %81, %84 : vector<8x8xf32>
    %86 = math.exp %85 : vector<8x8xf32>
    %cst_31 = arith.constant dense<0.000000e+00> : vector<8xf32>
    %87 = vector.multi_reduction <add>, %86, %cst_31 [1] : vector<8x8xf32> to vector<8xf32>
    %88 = vector.shape_cast %87 : vector<8xf32> to vector<8x1xf32>
    %89 = tpu.reciprocal %88 {approx = true} : vector<8x1xf32> -> vector<8x1xf32>
    %90 = vector.broadcast %89 : vector<8x1xf32> to vector<8x8xf32>
    %91 = arith.mulf %86, %90 : vector<8x8xf32>
    %cst_32 = arith.constant dense<0.000000e+00> : vector<8x8xf32>
    %92 = tpu.matmul %91, %76, %cst_32 {dimension_numbers = #tpu.dot_dimension_numbers<[1], [0], [0], [1], [0, 0, 1, 1], [], []>} : vector<8x8xf32>, vector<8x8xf32>, vector<8x8xf32> -> vector<8x8xf32>
    %93 = vector.extract_strided_slice %31 {offsets = [0, 24], sizes = [8, 8], strides = [1, 1]} : vector<8x32xf32> to vector<8x8xf32>
    %94 = vector.extract_strided_slice %32 {offsets = [0, 24], sizes = [8, 8], strides = [1, 1]} : vector<8x32xf32> to vector<8x8xf32>
    %95 = vector.extract_strided_slice %33 {offsets = [0, 24], sizes = [8, 8], strides = [1, 1]} : vector<8x32xf32> to vector<8x8xf32>
    %96 = tpu.transpose %94, [1, 0] : vector<8x8xf32> -> vector<8x8xf32>
    %cst_33 = arith.constant dense<0.000000e+00> : vector<8x8xf32>
    %97 = tpu.matmul %93, %96, %cst_33 {dimension_numbers = #tpu.dot_dimension_numbers<[1], [0], [0], [1], [0, 0, 1, 1], [], []>} : vector<8x8xf32>, vector<8x8xf32>, vector<8x8xf32> -> vector<8x8xf32>
    %cst_34 = arith.constant 0.353553385 : f32
    %98 = vector.broadcast %cst_34 : f32 to vector<8x8xf32>
    %99 = arith.mulf %97, %98 : vector<8x8xf32>
    %100 = arith.addf %99, %35 : vector<8x8xf32>
    %cst_35 = arith.constant dense<0xFF800000> : vector<8xf32>
    %101 = vector.multi_reduction <maximumf>, %100, %cst_35 [1] : vector<8x8xf32> to vector<8xf32>
    %102 = vector.shape_cast %101 : vector<8xf32> to vector<8x1xf32>
    %103 = vector.broadcast %102 : vector<8x1xf32> to vector<8x8xf32>
    %104 = arith.subf %100, %103 : vector<8x8xf32>
    %105 = math.exp %104 : vector<8x8xf32>
    %cst_36 = arith.constant dense<0.000000e+00> : vector<8xf32>
    %106 = vector.multi_reduction <add>, %105, %cst_36 [1] : vector<8x8xf32> to vector<8xf32>
    %107 = vector.shape_cast %106 : vector<8xf32> to vector<8x1xf32>
    %108 = tpu.reciprocal %107 {approx = true} : vector<8x1xf32> -> vector<8x1xf32>
    %109 = vector.broadcast %108 : vector<8x1xf32> to vector<8x8xf32>
    %110 = arith.mulf %105, %109 : vector<8x8xf32>
    %cst_37 = arith.constant dense<0.000000e+00> : vector<8x8xf32>
    %111 = tpu.matmul %110, %95, %cst_37 {dimension_numbers = #tpu.dot_dimension_numbers<[1], [0], [0], [1], [0, 0, 1, 1], [], []>} : vector<8x8xf32>, vector<8x8xf32>, vector<8x8xf32> -> vector<8x8xf32>
    %112 = tpu.concatenate %54, %73, %92, %111 in 1 : vector<8x8xf32>, vector<8x8xf32>, vector<8x8xf32>, vector<8x8xf32> -> vector<8x32xf32>
    %c0_38 = arith.constant 0 : index
    %c0_39 = arith.constant 0 : index
    %113 = vector.load %arg7[%c0_38, %c0_39] : memref<32x32xf32, #tpu.memory_space<vmem>>, vector<32x32xf32>
    %cst_40 = arith.constant dense<0.000000e+00> : vector<8x32xf32>
    %114 = tpu.matmul %112, %113, %cst_40 {dimension_numbers = #tpu.dot_dimension_numbers<[1], [0], [0], [1], [0, 0, 1, 1], [], []>} : vector<8x32xf32>, vector<32x32xf32>, vector<8x32xf32> -> vector<8x32xf32>
    %c0_41 = arith.constant 0 : index
    %c0_42 = arith.constant 0 : index
    %115 = vector.load %arg8[%c0_41, %c0_42] : memref<1x32xf32, #tpu.memory_space<vmem>>, vector<1x32xf32>
    %116 = vector.broadcast %115 : vector<1x32xf32> to vector<8x32xf32>
    %117 = arith.addf %114, %116 : vector<8x32xf32>
    %118 = arith.addf %1, %117 : vector<8x32xf32>
    %c0_43 = arith.constant 0 : index
    %c0_44 = arith.constant 0 : index
    %c0_45 = arith.constant 0 : index
    %119 = vector.load %arg9[%c0_43, %c0_44, %c0_45] : memref<1x8x32xf32, #tpu.memory_space<vmem>>, vector<1x8x32xf32>
    %120 = vector.shape_cast %119 : vector<1x8x32xf32> to vector<8x32xf32>
    %121 = vector.shape_cast %118 : vector<8x32xf32> to vector<1x8x32xf32>
    tpu.vector_store %arg9[%c0_43, %c0_44, %c0_45], %121 {strides = array<i32>} : memref<1x8x32xf32, #tpu.memory_space<vmem>>, vector<1x8x32xf32>,
    return
  }
  func.func @transform_0(%arg0: i32) -> (i32, i32, i32) {
    %c0_i32 = arith.constant 0 : i32
    %c0_i32_0 = arith.constant 0 : i32
    %c0_i32_1 = arith.constant 0 : i32
    return %arg0, %c0_i32, %c0_i32_0 : i32, i32, i32
  }
  func.func @transform_1(%arg0: i32) -> (i32, i32, i32) {
    %c0_i32 = arith.constant 0 : i32
    %c0_i32_0 = arith.constant 0 : i32
    %c0_i32_1 = arith.constant 0 : i32
    return %arg0, %c0_i32, %c0_i32_0 : i32, i32, i32
  }
  func.func @transform_2(%arg0: i32) -> (i32, i32) {
    %c0_i32 = arith.constant 0 : i32
    %c0_i32_0 = arith.constant 0 : i32
    %c0_i32_1 = arith.constant 0 : i32
    return %c0_i32, %c0_i32_0 : i32, i32
  }
  func.func @transform_3(%arg0: i32) -> (i32, i32) {
    %c0_i32 = arith.constant 0 : i32
    %c0_i32_0 = arith.constant 0 : i32
    %c0_i32_1 = arith.constant 0 : i32
    return %c0_i32, %c0_i32_0 : i32, i32
  }
  func.func @transform_4(%arg0: i32) -> (i32, i32) {
    %c0_i32 = arith.constant 0 : i32
    %c0_i32_0 = arith.constant 0 : i32
    %c0_i32_1 = arith.constant 0 : i32
    return %c0_i32, %c0_i32_0 : i32, i32
  }
  func.func @transform_5(%arg0: i32) -> (i32, i32) {
    %c0_i32 = arith.constant 0 : i32
    %c0_i32_0 = arith.constant 0 : i32
    %c0_i32_1 = arith.constant 0 : i32
    return %c0_i32, %c0_i32_0 : i32, i32
  }
  func.func @transform_6(%arg0: i32) -> (i32, i32) {
    %c0_i32 = arith.constant 0 : i32
    %c0_i32_0 = arith.constant 0 : i32
    %c0_i32_1 = arith.constant 0 : i32
    return %c0_i32, %c0_i32_0 : i32, i32
  }
  func.func @transform_7(%arg0: i32) -> (i32, i32) {
    %c0_i32 = arith.constant 0 : i32
    %c0_i32_0 = arith.constant 0 : i32
    %c0_i32_1 = arith.constant 0 : i32
    return %c0_i32, %c0_i32_0 : i32, i32
  }
  func.func @transform_8(%arg0: i32) -> (i32, i32, i32) {
    %c0_i32 = arith.constant 0 : i32
    %c0_i32_0 = arith.constant 0 : i32
    %c0_i32_1 = arith.constant 0 : i32
    return %arg0, %c0_i32, %c0_i32_0 : i32, i32, i32
  }
}

module attributes {stable_mosaic.version = 11 : i64} {
  func.func @_attn_sublayer_kernel(%arg0: i32, %arg1: memref<1x8x32xf32, #tpu.memory_space<vmem>>, %arg2: memref<1x8x32xf32, #tpu.memory_space<vmem>>, %arg3: memref<1x8x8xf32, #tpu.memory_space<vmem>>, %arg4: memref<1x32xf32, #tpu.memory_space<vmem>>, %arg5: memref<1x32xf32, #tpu.memory_space<vmem>>, %arg6: memref<32x96xf32, #tpu.memory_space<vmem>>, %arg7: memref<1x96xf32, #tpu.memory_space<vmem>>, %arg8: memref<32x32xf32, #tpu.memory_space<vmem>>, %arg9: memref<1x32xf32, #tpu.memory_space<vmem>>, %arg10: memref<1x8x32xf32, #tpu.memory_space<vmem>>) attributes {dimension_semantics = [#tpu.dimension_semantics<parallel>], iteration_bounds = array<i64: 2>, scalar_prefetch = 0 : i64, scratch_operands = 0 : i64, tpu.core_type = #tpu.core_type<tc>, window_params = [{transform_indices = @transform_0, window_bounds = array<i64: 1, 8, 32>}, {transform_indices = @transform_1, window_bounds = array<i64: 1, 8, 32>}, {transform_indices = @transform_2, window_bounds = array<i64: 1, 8, 8>}, {pipeline_mode = #tpu.pipeline_mode<synchronous>, transform_indices = @transform_3, window_bounds = array<i64: 1, 32>}, {pipeline_mode = #tpu.pipeline_mode<synchronous>, transform_indices = @transform_4, window_bounds = array<i64: 1, 32>}, {pipeline_mode = #tpu.pipeline_mode<synchronous>, transform_indices = @transform_5, window_bounds = array<i64: 32, 96>}, {pipeline_mode = #tpu.pipeline_mode<synchronous>, transform_indices = @transform_6, window_bounds = array<i64: 1, 96>}, {pipeline_mode = #tpu.pipeline_mode<synchronous>, transform_indices = @transform_7, window_bounds = array<i64: 32, 32>}, {pipeline_mode = #tpu.pipeline_mode<synchronous>, transform_indices = @transform_8, window_bounds = array<i64: 1, 32>}, {transform_indices = @transform_9, window_bounds = array<i64: 1, 8, 32>}]} {
    %c0 = arith.constant 0 : index
    %c0_0 = arith.constant 0 : index
    %c0_1 = arith.constant 0 : index
    %0 = vector.load %arg1[%c0, %c0_0, %c0_1] : memref<1x8x32xf32, #tpu.memory_space<vmem>>, vector<1x8x32xf32>
    %1 = vector.shape_cast %0 : vector<1x8x32xf32> to vector<8x32xf32>
    %c0_2 = arith.constant 0 : index
    %c0_3 = arith.constant 0 : index
    %2 = vector.load %arg4[%c0_2, %c0_3] : memref<1x32xf32, #tpu.memory_space<vmem>>, vector<1x32xf32>
    %c0_4 = arith.constant 0 : index
    %c0_5 = arith.constant 0 : index
    %3 = vector.load %arg5[%c0_4, %c0_5] : memref<1x32xf32, #tpu.memory_space<vmem>>, vector<1x32xf32>
    %cst = arith.constant dense<0.000000e+00> : vector<8xf32>
    %4 = vector.multi_reduction <add>, %1, %cst [1] : vector<8x32xf32> to vector<8xf32>
    %5 = vector.shape_cast %4 : vector<8xf32> to vector<8x1xf32>
    %cst_6 = arith.constant 3.200000e+01 : f32
    %6 = vector.broadcast %cst_6 : f32 to vector<8x1xf32>
    %7 = arith.divf %5, %6 : vector<8x1xf32>
    %8 = vector.broadcast %7 : vector<8x1xf32> to vector<8x32xf32>
    %9 = arith.subf %1, %8 : vector<8x32xf32>
    %10 = arith.mulf %9, %9 : vector<8x32xf32>
    %cst_7 = arith.constant dense<0.000000e+00> : vector<8xf32>
    %11 = vector.multi_reduction <add>, %10, %cst_7 [1] : vector<8x32xf32> to vector<8xf32>
    %12 = vector.shape_cast %11 : vector<8xf32> to vector<8x1xf32>
    %cst_8 = arith.constant 3.200000e+01 : f32
    %13 = vector.broadcast %cst_8 : f32 to vector<8x1xf32>
    %14 = arith.divf %12, %13 : vector<8x1xf32>
    %15 = vector.broadcast %7 : vector<8x1xf32> to vector<8x32xf32>
    %16 = arith.subf %1, %15 : vector<8x32xf32>
    %cst_9 = arith.constant 9.99999997E-7 : f32
    %17 = vector.broadcast %cst_9 : f32 to vector<8x1xf32>
    %18 = arith.addf %14, %17 : vector<8x1xf32>
    %19 = math.rsqrt %18 : vector<8x1xf32>
    %20 = vector.broadcast %19 : vector<8x1xf32> to vector<8x32xf32>
    %21 = arith.mulf %16, %20 : vector<8x32xf32>
    %22 = vector.broadcast %2 : vector<1x32xf32> to vector<8x32xf32>
    %23 = arith.mulf %21, %22 : vector<8x32xf32>
    %24 = vector.broadcast %3 : vector<1x32xf32> to vector<8x32xf32>
    %25 = arith.addf %23, %24 : vector<8x32xf32>
    %c0_10 = arith.constant 0 : index
    %c0_11 = arith.constant 0 : index
    %26 = vector.load %arg6[%c0_10, %c0_11] : memref<32x96xf32, #tpu.memory_space<vmem>>, vector<32x96xf32>
    %c0_12 = arith.constant 0 : index
    %c0_13 = arith.constant 0 : index
    %27 = vector.load %arg7[%c0_12, %c0_13] : memref<1x96xf32, #tpu.memory_space<vmem>>, vector<1x96xf32>
    %c0_14 = arith.constant 0 : index
    %c0_15 = arith.constant 0 : index
    %c0_16 = arith.constant 0 : index
    %28 = vector.load %arg2[%c0_14, %c0_15, %c0_16] : memref<1x8x32xf32, #tpu.memory_space<vmem>>, vector<1x8x32xf32>
    %29 = vector.shape_cast %28 : vector<1x8x32xf32> to vector<8x32xf32>
    %30 = vector.extract_strided_slice %26 {offsets = [0, 0], sizes = [32, 32], strides = [1, 1]} : vector<32x96xf32> to vector<32x32xf32>
    %cst_17 = arith.constant dense<0.000000e+00> : vector<8x32xf32>
    %31 = tpu.matmul %25, %30, %cst_17 {dimension_numbers = #tpu.dot_dimension_numbers<[1], [0], [0], [1], [0, 0, 1, 1], [], []>} : vector<8x32xf32>, vector<32x32xf32>, vector<8x32xf32> -> vector<8x32xf32>
    %32 = vector.extract_strided_slice %27 {offsets = [0, 0], sizes = [1, 32], strides = [1, 1]} : vector<1x96xf32> to vector<1x32xf32>
    %33 = vector.broadcast %32 : vector<1x32xf32> to vector<8x32xf32>
    %34 = arith.addf %31, %33 : vector<8x32xf32>
    %35 = vector.extract_strided_slice %26 {offsets = [0, 32], sizes = [32, 64], strides = [1, 1]} : vector<32x96xf32> to vector<32x64xf32>
    %cst_18 = arith.constant dense<0.000000e+00> : vector<8x64xf32>
    %36 = tpu.matmul %29, %35, %cst_18 {dimension_numbers = #tpu.dot_dimension_numbers<[1], [0], [0], [1], [0, 0, 1, 1], [], []>} : vector<8x32xf32>, vector<32x64xf32>, vector<8x64xf32> -> vector<8x64xf32>
    %37 = vector.extract_strided_slice %27 {offsets = [0, 32], sizes = [1, 64], strides = [1, 1]} : vector<1x96xf32> to vector<1x64xf32>
    %38 = vector.broadcast %37 : vector<1x64xf32> to vector<8x64xf32>
    %39 = arith.addf %36, %38 : vector<8x64xf32>
    %40 = vector.extract_strided_slice %39 {offsets = [0, 0], sizes = [8, 32], strides = [1, 1]} : vector<8x64xf32> to vector<8x32xf32>
    %41 = vector.extract_strided_slice %39 {offsets = [0, 32], sizes = [8, 32], strides = [1, 1]} : vector<8x64xf32> to vector<8x32xf32>
    %c0_19 = arith.constant 0 : index
    %c0_20 = arith.constant 0 : index
    %c0_21 = arith.constant 0 : index
    %42 = vector.load %arg3[%c0_19, %c0_20, %c0_21] : memref<1x8x8xf32, #tpu.memory_space<vmem>>, vector<1x8x8xf32>
    %43 = vector.shape_cast %42 : vector<1x8x8xf32> to vector<8x8xf32>
    %44 = vector.extract_strided_slice %34 {offsets = [0, 0], sizes = [8, 8], strides = [1, 1]} : vector<8x32xf32> to vector<8x8xf32>
    %45 = vector.extract_strided_slice %40 {offsets = [0, 0], sizes = [8, 8], strides = [1, 1]} : vector<8x32xf32> to vector<8x8xf32>
    %46 = vector.extract_strided_slice %41 {offsets = [0, 0], sizes = [8, 8], strides = [1, 1]} : vector<8x32xf32> to vector<8x8xf32>
    %47 = tpu.transpose %45, [1, 0] : vector<8x8xf32> -> vector<8x8xf32>
    %cst_22 = arith.constant dense<0.000000e+00> : vector<8x8xf32>
    %48 = tpu.matmul %44, %47, %cst_22 {dimension_numbers = #tpu.dot_dimension_numbers<[1], [0], [0], [1], [0, 0, 1, 1], [], []>} : vector<8x8xf32>, vector<8x8xf32>, vector<8x8xf32> -> vector<8x8xf32>
    %cst_23 = arith.constant 0.353553385 : f32
    %49 = vector.broadcast %cst_23 : f32 to vector<8x8xf32>
    %50 = arith.mulf %48, %49 : vector<8x8xf32>
    %51 = arith.addf %50, %43 : vector<8x8xf32>
    %cst_24 = arith.constant dense<0xFF800000> : vector<8xf32>
    %52 = vector.multi_reduction <maximumf>, %51, %cst_24 [1] : vector<8x8xf32> to vector<8xf32>
    %53 = vector.shape_cast %52 : vector<8xf32> to vector<8x1xf32>
    %54 = vector.broadcast %53 : vector<8x1xf32> to vector<8x8xf32>
    %55 = arith.subf %51, %54 : vector<8x8xf32>
    %56 = math.exp %55 : vector<8x8xf32>
    %cst_25 = arith.constant dense<0.000000e+00> : vector<8xf32>
    %57 = vector.multi_reduction <add>, %56, %cst_25 [1] : vector<8x8xf32> to vector<8xf32>
    %58 = vector.shape_cast %57 : vector<8xf32> to vector<8x1xf32>
    %59 = tpu.reciprocal %58 {approx = true} : vector<8x1xf32> -> vector<8x1xf32>
    %60 = vector.broadcast %59 : vector<8x1xf32> to vector<8x8xf32>
    %61 = arith.mulf %56, %60 : vector<8x8xf32>
    %cst_26 = arith.constant dense<0.000000e+00> : vector<8x8xf32>
    %62 = tpu.matmul %61, %46, %cst_26 {dimension_numbers = #tpu.dot_dimension_numbers<[1], [0], [0], [1], [0, 0, 1, 1], [], []>} : vector<8x8xf32>, vector<8x8xf32>, vector<8x8xf32> -> vector<8x8xf32>
    %63 = vector.extract_strided_slice %34 {offsets = [0, 8], sizes = [8, 8], strides = [1, 1]} : vector<8x32xf32> to vector<8x8xf32>
    %64 = vector.extract_strided_slice %40 {offsets = [0, 8], sizes = [8, 8], strides = [1, 1]} : vector<8x32xf32> to vector<8x8xf32>
    %65 = vector.extract_strided_slice %41 {offsets = [0, 8], sizes = [8, 8], strides = [1, 1]} : vector<8x32xf32> to vector<8x8xf32>
    %66 = tpu.transpose %64, [1, 0] : vector<8x8xf32> -> vector<8x8xf32>
    %cst_27 = arith.constant dense<0.000000e+00> : vector<8x8xf32>
    %67 = tpu.matmul %63, %66, %cst_27 {dimension_numbers = #tpu.dot_dimension_numbers<[1], [0], [0], [1], [0, 0, 1, 1], [], []>} : vector<8x8xf32>, vector<8x8xf32>, vector<8x8xf32> -> vector<8x8xf32>
    %cst_28 = arith.constant 0.353553385 : f32
    %68 = vector.broadcast %cst_28 : f32 to vector<8x8xf32>
    %69 = arith.mulf %67, %68 : vector<8x8xf32>
    %70 = arith.addf %69, %43 : vector<8x8xf32>
    %cst_29 = arith.constant dense<0xFF800000> : vector<8xf32>
    %71 = vector.multi_reduction <maximumf>, %70, %cst_29 [1] : vector<8x8xf32> to vector<8xf32>
    %72 = vector.shape_cast %71 : vector<8xf32> to vector<8x1xf32>
    %73 = vector.broadcast %72 : vector<8x1xf32> to vector<8x8xf32>
    %74 = arith.subf %70, %73 : vector<8x8xf32>
    %75 = math.exp %74 : vector<8x8xf32>
    %cst_30 = arith.constant dense<0.000000e+00> : vector<8xf32>
    %76 = vector.multi_reduction <add>, %75, %cst_30 [1] : vector<8x8xf32> to vector<8xf32>
    %77 = vector.shape_cast %76 : vector<8xf32> to vector<8x1xf32>
    %78 = tpu.reciprocal %77 {approx = true} : vector<8x1xf32> -> vector<8x1xf32>
    %79 = vector.broadcast %78 : vector<8x1xf32> to vector<8x8xf32>
    %80 = arith.mulf %75, %79 : vector<8x8xf32>
    %cst_31 = arith.constant dense<0.000000e+00> : vector<8x8xf32>
    %81 = tpu.matmul %80, %65, %cst_31 {dimension_numbers = #tpu.dot_dimension_numbers<[1], [0], [0], [1], [0, 0, 1, 1], [], []>} : vector<8x8xf32>, vector<8x8xf32>, vector<8x8xf32> -> vector<8x8xf32>
    %82 = vector.extract_strided_slice %34 {offsets = [0, 16], sizes = [8, 8], strides = [1, 1]} : vector<8x32xf32> to vector<8x8xf32>
    %83 = vector.extract_strided_slice %40 {offsets = [0, 16], sizes = [8, 8], strides = [1, 1]} : vector<8x32xf32> to vector<8x8xf32>
    %84 = vector.extract_strided_slice %41 {offsets = [0, 16], sizes = [8, 8], strides = [1, 1]} : vector<8x32xf32> to vector<8x8xf32>
    %85 = tpu.transpose %83, [1, 0] : vector<8x8xf32> -> vector<8x8xf32>
    %cst_32 = arith.constant dense<0.000000e+00> : vector<8x8xf32>
    %86 = tpu.matmul %82, %85, %cst_32 {dimension_numbers = #tpu.dot_dimension_numbers<[1], [0], [0], [1], [0, 0, 1, 1], [], []>} : vector<8x8xf32>, vector<8x8xf32>, vector<8x8xf32> -> vector<8x8xf32>
    %cst_33 = arith.constant 0.353553385 : f32
    %87 = vector.broadcast %cst_33 : f32 to vector<8x8xf32>
    %88 = arith.mulf %86, %87 : vector<8x8xf32>
    %89 = arith.addf %88, %43 : vector<8x8xf32>
    %cst_34 = arith.constant dense<0xFF800000> : vector<8xf32>
    %90 = vector.multi_reduction <maximumf>, %89, %cst_34 [1] : vector<8x8xf32> to vector<8xf32>
    %91 = vector.shape_cast %90 : vector<8xf32> to vector<8x1xf32>
    %92 = vector.broadcast %91 : vector<8x1xf32> to vector<8x8xf32>
    %93 = arith.subf %89, %92 : vector<8x8xf32>
    %94 = math.exp %93 : vector<8x8xf32>
    %cst_35 = arith.constant dense<0.000000e+00> : vector<8xf32>
    %95 = vector.multi_reduction <add>, %94, %cst_35 [1] : vector<8x8xf32> to vector<8xf32>
    %96 = vector.shape_cast %95 : vector<8xf32> to vector<8x1xf32>
    %97 = tpu.reciprocal %96 {approx = true} : vector<8x1xf32> -> vector<8x1xf32>
    %98 = vector.broadcast %97 : vector<8x1xf32> to vector<8x8xf32>
    %99 = arith.mulf %94, %98 : vector<8x8xf32>
    %cst_36 = arith.constant dense<0.000000e+00> : vector<8x8xf32>
    %100 = tpu.matmul %99, %84, %cst_36 {dimension_numbers = #tpu.dot_dimension_numbers<[1], [0], [0], [1], [0, 0, 1, 1], [], []>} : vector<8x8xf32>, vector<8x8xf32>, vector<8x8xf32> -> vector<8x8xf32>
    %101 = vector.extract_strided_slice %34 {offsets = [0, 24], sizes = [8, 8], strides = [1, 1]} : vector<8x32xf32> to vector<8x8xf32>
    %102 = vector.extract_strided_slice %40 {offsets = [0, 24], sizes = [8, 8], strides = [1, 1]} : vector<8x32xf32> to vector<8x8xf32>
    %103 = vector.extract_strided_slice %41 {offsets = [0, 24], sizes = [8, 8], strides = [1, 1]} : vector<8x32xf32> to vector<8x8xf32>
    %104 = tpu.transpose %102, [1, 0] : vector<8x8xf32> -> vector<8x8xf32>
    %cst_37 = arith.constant dense<0.000000e+00> : vector<8x8xf32>
    %105 = tpu.matmul %101, %104, %cst_37 {dimension_numbers = #tpu.dot_dimension_numbers<[1], [0], [0], [1], [0, 0, 1, 1], [], []>} : vector<8x8xf32>, vector<8x8xf32>, vector<8x8xf32> -> vector<8x8xf32>
    %cst_38 = arith.constant 0.353553385 : f32
    %106 = vector.broadcast %cst_38 : f32 to vector<8x8xf32>
    %107 = arith.mulf %105, %106 : vector<8x8xf32>
    %108 = arith.addf %107, %43 : vector<8x8xf32>
    %cst_39 = arith.constant dense<0xFF800000> : vector<8xf32>
    %109 = vector.multi_reduction <maximumf>, %108, %cst_39 [1] : vector<8x8xf32> to vector<8xf32>
    %110 = vector.shape_cast %109 : vector<8xf32> to vector<8x1xf32>
    %111 = vector.broadcast %110 : vector<8x1xf32> to vector<8x8xf32>
    %112 = arith.subf %108, %111 : vector<8x8xf32>
    %113 = math.exp %112 : vector<8x8xf32>
    %cst_40 = arith.constant dense<0.000000e+00> : vector<8xf32>
    %114 = vector.multi_reduction <add>, %113, %cst_40 [1] : vector<8x8xf32> to vector<8xf32>
    %115 = vector.shape_cast %114 : vector<8xf32> to vector<8x1xf32>
    %116 = tpu.reciprocal %115 {approx = true} : vector<8x1xf32> -> vector<8x1xf32>
    %117 = vector.broadcast %116 : vector<8x1xf32> to vector<8x8xf32>
    %118 = arith.mulf %113, %117 : vector<8x8xf32>
    %cst_41 = arith.constant dense<0.000000e+00> : vector<8x8xf32>
    %119 = tpu.matmul %118, %103, %cst_41 {dimension_numbers = #tpu.dot_dimension_numbers<[1], [0], [0], [1], [0, 0, 1, 1], [], []>} : vector<8x8xf32>, vector<8x8xf32>, vector<8x8xf32> -> vector<8x8xf32>
    %120 = tpu.concatenate %62, %81, %100, %119 in 1 : vector<8x8xf32>, vector<8x8xf32>, vector<8x8xf32>, vector<8x8xf32> -> vector<8x32xf32>
    %c0_42 = arith.constant 0 : index
    %c0_43 = arith.constant 0 : index
    %121 = vector.load %arg8[%c0_42, %c0_43] : memref<32x32xf32, #tpu.memory_space<vmem>>, vector<32x32xf32>
    %cst_44 = arith.constant dense<0.000000e+00> : vector<8x32xf32>
    %122 = tpu.matmul %120, %121, %cst_44 {dimension_numbers = #tpu.dot_dimension_numbers<[1], [0], [0], [1], [0, 0, 1, 1], [], []>} : vector<8x32xf32>, vector<32x32xf32>, vector<8x32xf32> -> vector<8x32xf32>
    %c0_45 = arith.constant 0 : index
    %c0_46 = arith.constant 0 : index
    %123 = vector.load %arg9[%c0_45, %c0_46] : memref<1x32xf32, #tpu.memory_space<vmem>>, vector<1x32xf32>
    %124 = vector.broadcast %123 : vector<1x32xf32> to vector<8x32xf32>
    %125 = arith.addf %122, %124 : vector<8x32xf32>
    %126 = arith.addf %1, %125 : vector<8x32xf32>
    %c0_47 = arith.constant 0 : index
    %c0_48 = arith.constant 0 : index
    %c0_49 = arith.constant 0 : index
    %127 = vector.load %arg10[%c0_47, %c0_48, %c0_49] : memref<1x8x32xf32, #tpu.memory_space<vmem>>, vector<1x8x32xf32>
    %128 = vector.shape_cast %127 : vector<1x8x32xf32> to vector<8x32xf32>
    %129 = vector.shape_cast %126 : vector<8x32xf32> to vector<1x8x32xf32>
    tpu.vector_store %arg10[%c0_47, %c0_48, %c0_49], %129 {strides = array<i32>} : memref<1x8x32xf32, #tpu.memory_space<vmem>>, vector<1x8x32xf32>,
    return
  }
  func.func @transform_0(%arg0: i32) -> (i32, i32, i32) {
    %c0_i32 = arith.constant 0 : i32
    %c0_i32_0 = arith.constant 0 : i32
    %c0_i32_1 = arith.constant 0 : i32
    return %arg0, %c0_i32, %c0_i32_0 : i32, i32, i32
  }
  func.func @transform_1(%arg0: i32) -> (i32, i32, i32) {
    %c0_i32 = arith.constant 0 : i32
    %c0_i32_0 = arith.constant 0 : i32
    %c0_i32_1 = arith.constant 0 : i32
    return %arg0, %c0_i32, %c0_i32_0 : i32, i32, i32
  }
  func.func @transform_2(%arg0: i32) -> (i32, i32, i32) {
    %c0_i32 = arith.constant 0 : i32
    %c0_i32_0 = arith.constant 0 : i32
    %c0_i32_1 = arith.constant 0 : i32
    return %arg0, %c0_i32, %c0_i32_0 : i32, i32, i32
  }
  func.func @transform_3(%arg0: i32) -> (i32, i32) {
    %c0_i32 = arith.constant 0 : i32
    %c0_i32_0 = arith.constant 0 : i32
    %c0_i32_1 = arith.constant 0 : i32
    return %c0_i32, %c0_i32_0 : i32, i32
  }
  func.func @transform_4(%arg0: i32) -> (i32, i32) {
    %c0_i32 = arith.constant 0 : i32
    %c0_i32_0 = arith.constant 0 : i32
    %c0_i32_1 = arith.constant 0 : i32
    return %c0_i32, %c0_i32_0 : i32, i32
  }
  func.func @transform_5(%arg0: i32) -> (i32, i32) {
    %c0_i32 = arith.constant 0 : i32
    %c0_i32_0 = arith.constant 0 : i32
    %c0_i32_1 = arith.constant 0 : i32
    return %c0_i32, %c0_i32_0 : i32, i32
  }
  func.func @transform_6(%arg0: i32) -> (i32, i32) {
    %c0_i32 = arith.constant 0 : i32
    %c0_i32_0 = arith.constant 0 : i32
    %c0_i32_1 = arith.constant 0 : i32
    return %c0_i32, %c0_i32_0 : i32, i32
  }
  func.func @transform_7(%arg0: i32) -> (i32, i32) {
    %c0_i32 = arith.constant 0 : i32
    %c0_i32_0 = arith.constant 0 : i32
    %c0_i32_1 = arith.constant 0 : i32
    return %c0_i32, %c0_i32_0 : i32, i32
  }
  func.func @transform_8(%arg0: i32) -> (i32, i32) {
    %c0_i32 = arith.constant 0 : i32
    %c0_i32_0 = arith.constant 0 : i32
    %c0_i32_1 = arith.constant 0 : i32
    return %c0_i32, %c0_i32_0 : i32, i32
  }
  func.func @transform_9(%arg0: i32) -> (i32, i32, i32) {
    %c0_i32 = arith.constant 0 : i32
    %c0_i32_0 = arith.constant 0 : i32
    %c0_i32_1 = arith.constant 0 : i32
    return %arg0, %c0_i32, %c0_i32_0 : i32, i32, i32
  }
}

module attributes {stable_mosaic.version = 11 : i64} {
  func.func @_gen_ce_kernel(%arg0: i32, %arg1: memref<16x32xf32, #tpu.memory_space<vmem>>, %arg2: memref<32x128xf32, #tpu.memory_space<vmem>>, %arg3: memref<1x128xf32, #tpu.memory_space<vmem>>, %arg4: memref<16x1xi32, #tpu.memory_space<vmem>>, %arg5: memref<16x128xf32, #tpu.memory_space<vmem>>, %arg6: memref<1x1xf32, #tpu.memory_space<vmem>>) attributes {dimension_semantics = [#tpu.dimension_semantics<arbitrary>], iteration_bounds = array<i64: 1>, scalar_prefetch = 0 : i64, scratch_operands = 0 : i64, tpu.core_type = #tpu.core_type<tc>, window_params = [{pipeline_mode = #tpu.pipeline_mode<synchronous>, transform_indices = @transform_0, window_bounds = array<i64: 16, 32>}, {pipeline_mode = #tpu.pipeline_mode<synchronous>, transform_indices = @transform_1, window_bounds = array<i64: 32, 128>}, {pipeline_mode = #tpu.pipeline_mode<synchronous>, transform_indices = @transform_2, window_bounds = array<i64: 1, 128>}, {pipeline_mode = #tpu.pipeline_mode<synchronous>, transform_indices = @transform_3, window_bounds = array<i64: 16, 1>}, {pipeline_mode = #tpu.pipeline_mode<synchronous>, transform_indices = @transform_4, window_bounds = array<i64: 16, 128>}, {pipeline_mode = #tpu.pipeline_mode<synchronous>, transform_indices = @transform_5, window_bounds = array<i64: 1, 1>}]} {
    %c0 = arith.constant 0 : index
    %c0_0 = arith.constant 0 : index
    %0 = vector.load %arg1[%c0, %c0_0] : memref<16x32xf32, #tpu.memory_space<vmem>>, vector<16x32xf32>
    %c0_1 = arith.constant 0 : index
    %c0_2 = arith.constant 0 : index
    %1 = vector.load %arg2[%c0_1, %c0_2] : memref<32x128xf32, #tpu.memory_space<vmem>>, vector<32x128xf32>
    %cst = arith.constant dense<0.000000e+00> : vector<16x128xf32>
    %2 = tpu.matmul %0, %1, %cst {dimension_numbers = #tpu.dot_dimension_numbers<[1], [0], [0], [1], [0, 0, 1, 1], [], []>} : vector<16x32xf32>, vector<32x128xf32>, vector<16x128xf32> -> vector<16x128xf32>
    %c0_3 = arith.constant 0 : index
    %c0_4 = arith.constant 0 : index
    %3 = vector.load %arg3[%c0_3, %c0_4] : memref<1x128xf32, #tpu.memory_space<vmem>>, vector<1x128xf32>
    %4 = vector.broadcast %3 : vector<1x128xf32> to vector<16x128xf32>
    %5 = arith.addf %2, %4 : vector<16x128xf32>
    %c0_5 = arith.constant 0 : index
    %c0_6 = arith.constant 0 : index
    %6 = vector.load %arg5[%c0_5, %c0_6] : memref<16x128xf32, #tpu.memory_space<vmem>>, vector<16x128xf32>
    tpu.vector_store %arg5[%c0_5, %c0_6], %5 {strides = array<i32>} : memref<16x128xf32, #tpu.memory_space<vmem>>, vector<16x128xf32>,
    %cst_7 = arith.constant dense<0xFF800000> : vector<16xf32>
    %7 = vector.multi_reduction <maximumf>, %5, %cst_7 [1] : vector<16x128xf32> to vector<16xf32>
    %8 = vector.shape_cast %7 : vector<16xf32> to vector<16x1xf32>
    %9 = vector.broadcast %8 : vector<16x1xf32> to vector<16x128xf32>
    %10 = arith.subf %5, %9 : vector<16x128xf32>
    %11 = math.exp %10 : vector<16x128xf32>
    %cst_8 = arith.constant dense<0.000000e+00> : vector<16xf32>
    %12 = vector.multi_reduction <add>, %11, %cst_8 [1] : vector<16x128xf32> to vector<16xf32>
    %13 = vector.shape_cast %12 : vector<16xf32> to vector<16x1xf32>
    %14 = math.log %13 : vector<16x1xf32>
    %15 = arith.addf %14, %8 : vector<16x1xf32>
    %c0_9 = arith.constant 0 : index
    %c0_10 = arith.constant 0 : index
    %16 = vector.load %arg4[%c0_9, %c0_10] : memref<16x1xi32, #tpu.memory_space<vmem>>, vector<16x1xi32>
    %17 = tpu.iota {dimensions = array<i32: 1>} : vector<16x128xi32>
    %18 = vector.broadcast %16 : vector<16x1xi32> to vector<16x128xi32>
    %19 = arith.cmpi eq, %17, %18 : vector<16x128xi32>
    %cst_11 = arith.constant 0.000000e+00 : f32
    %20 = vector.broadcast %cst_11 : f32 to vector<16x128xf32>
    %21 = arith.select %19, %5, %20 : vector<16x128xi1>, vector<16x128xf32>
    %cst_12 = arith.constant dense<0.000000e+00> : vector<16xf32>
    %22 = vector.multi_reduction <add>, %21, %cst_12 [1] : vector<16x128xf32> to vector<16xf32>
    %23 = vector.shape_cast %22 : vector<16xf32> to vector<16x1xf32>
    %24 = arith.subf %15, %23 : vector<16x1xf32>
    %25 = vector.shape_cast %24 : vector<16x1xf32> to vector<1x16x1xf32>
    %cst_13 = arith.constant dense<0.000000e+00> : vector<1xf32>
    %26 = vector.multi_reduction <add>, %25, %cst_13 [1, 2] : vector<1x16x1xf32> to vector<1xf32>
    %27 = vector.shape_cast %26 : vector<1xf32> to vector<1x1x1xf32>
    %28 = vector.extract %27[0, 0, 0] : f32 from vector<1x1x1xf32>
    %cst_14 = arith.constant 1.600000e+01 : f32
    %29 = arith.divf %28, %cst_14 : f32
    %30 = vector.broadcast %29 : f32 to vector<1x1xf32>
    %c0_15 = arith.constant 0 : index
    %c0_16 = arith.constant 0 : index
    %31 = vector.load %arg6[%c0_15, %c0_16] : memref<1x1xf32, #tpu.memory_space<vmem>>, vector<1x1xf32>
    tpu.vector_store %arg6[%c0_15, %c0_16], %30 {strides = array<i32>} : memref<1x1xf32, #tpu.memory_space<vmem>>, vector<1x1xf32>,
    return
  }
  func.func @transform_0(%arg0: i32) -> (i32, i32) {
    %c0_i32 = arith.constant 0 : i32
    %c0_i32_0 = arith.constant 0 : i32
    %c0_i32_1 = arith.constant 0 : i32
    return %c0_i32, %c0_i32_0 : i32, i32
  }
  func.func @transform_1(%arg0: i32) -> (i32, i32) {
    %c0_i32 = arith.constant 0 : i32
    %c0_i32_0 = arith.constant 0 : i32
    %c0_i32_1 = arith.constant 0 : i32
    return %c0_i32, %c0_i32_0 : i32, i32
  }
  func.func @transform_2(%arg0: i32) -> (i32, i32) {
    %c0_i32 = arith.constant 0 : i32
    %c0_i32_0 = arith.constant 0 : i32
    %c0_i32_1 = arith.constant 0 : i32
    return %c0_i32, %c0_i32_0 : i32, i32
  }
  func.func @transform_3(%arg0: i32) -> (i32, i32) {
    %c0_i32 = arith.constant 0 : i32
    %c0_i32_0 = arith.constant 0 : i32
    %c0_i32_1 = arith.constant 0 : i32
    return %c0_i32, %c0_i32_0 : i32, i32
  }
  func.func @transform_4(%arg0: i32) -> (i32, i32) {
    %c0_i32 = arith.constant 0 : i32
    %c0_i32_0 = arith.constant 0 : i32
    %c0_i32_1 = arith.constant 0 : i32
    return %c0_i32, %c0_i32_0 : i32, i32
  }
  func.func @transform_5(%arg0: i32) -> (i32, i32) {
    %c0_i32 = arith.constant 0 : i32
    %c0_i32_0 = arith.constant 0 : i32
    %c0_i32_1 = arith.constant 0 : i32
    return %c0_i32, %c0_i32_0 : i32, i32
  }
}

</mosaic_0001>

<bundles_post_ra>
// kernel: forward.12
= control target key start
LH: loop header
LB: loop body
LE: loop exit
PB: predicated region body
PF: predicated region fallthrough
CT: control target
= control target key end

     0   :  { %s676_s24 = smov 0   ;;  %s757_s0 = inlined_call_operand.vmem [shape: f32[2,8,32], index: 0, kind: input, shape index: {}]   ;;  %s758_s1 = inlined_call_operand.vmem [shape: f32[1,32], index: 1, kind: input, shape index: {}]   ;;  %s759_s2 = inlined_call_operand.vmem [shape: f32[1,32], index: 2, kind: input, shape index: {}]   ;;  %s760_s3 = inlined_call_operand.vmem [shape: f32[32,64], index: 3, kind: input, shape index: {}]   ;;  %s761_s4 = inlined_call_operand.vmem [shape: f32[1,64], index: 4, kind: input, shape index: {}]   ;;  %s762_s5 = inlined_call_operand.vmem [shape: f32[64,32], index: 5, kind: input, shape index: {}]   ;;  %s763_s6 = inlined_call_operand.vmem [shape: f32[1,32], index: 6, kind: input, shape index: {}]   ;;  %s764_s7 = inlined_call_operand.vmem [shape: f32[2,8,32], index: 7, kind: output, shape index: {}]  }
   0x1 LB: > { %s535_s25 = sadd.s32 4294967295, %s631_s24   ;;  %p539_p0 = scmp.ge.s32.totalorder %s631_s24, 1  ;;  %s631_s24 = sphi %s676_s24, %s17_s24  }
   0x2   : > { %p236_p1 = scmp.lt.s32.totalorder %s631_s24, 3 }
   0x4   : > { %p237_p2 = pnand %p539_p0, %p236_p1 }
   0x5   : > { %p266_p3 = scmp.lt.s32.totalorder (!%p237_p2), %s535_s25, 1  ;;  %vm277_vm0 = vcmask (!%p237_p2), 261120   ;;  %v306_v7 = vld [vmem:[%s760_s3] sm:$0xff] (!%p237_p2)  ;;  %v307_v8 = vld [vmem:[%s760_s3 + $0x8] sm:$0xff] (!%p237_p2)  ;;  %v308_v9 = vld [vmem:[%s760_s3 + $0x10] sm:$0xff] (!%p237_p2)  ;;  %v633_v10 = vmov (!%p237_p2), 0.0|0.0  }
   0x6   : > { %240 = sbr.rel (%p237_p2) target bundleno = 763 (0x2fb), region = 48  ;;  %594 = vmatprep.subr.bf16.mxu0 (!%p237_p2), %v633_v10  ;;  %v595_v11 = vpack.c.bf16 (!%p237_p2), %v307_v8, %v306_v7  ;;  %v309_v12 = vld [vmem:[%s760_s3 + $0x18] sm:$0xff] (!%p237_p2)  ;;  %vm634_vm1 = vmmov (!%p237_p2), 0   ;;  %v635_v13 = vmov (!%p237_p2), 0.0   ;;  %600 = vmatprep.subr.bf16.mxu1 (!%p237_p2), %v633_v10  ;;  %v391_v15 = vld [vmem:[%s762_s5] sm:$0xff] (!%p237_p2)  ;;  %v392_v16 = vld [vmem:[%s762_s5 + $0x8] sm:$0xff] (!%p237_p2) }
   0x7   : > { %572 = vmatprep.mubr.msk.f32.mxu0 (!%p237_p2), %vm634_vm1, %v635_v13  ;;  %591 = vmatprep.mubr.msk.f32.mxu1 (!%p237_p2), %vm634_vm1, %v635_v13  ;;  %v598_v14 = vpack.c.bf16 (!%p237_p2), %v309_v12, %v308_v9  ;;  %v393_v17 = vld [vmem:[%s762_s5 + $0x10] sm:$0xff] (!%p237_p2)  ;;  %v601_v18 = vpack.c.bf16 (!%p237_p2), %v392_v16, %v391_v15  ;;  %v394_v19 = vld [vmem:[%s762_s5 + $0x18] sm:$0xff] (!%p237_p2)  ;;  %v395_v21 = vld [vmem:[%s762_s5 + $0x20] sm:$0xff] (!%p237_p2)  ;;  %vm406_vm2 = vcmask (!%p237_p2), 523264  }
   0x8   : > { %596 = vmatpush3.bf16.msra.mxu0 (!%p237_p2), %v595_v11  ;;  %v604_v20 = vpack.c.bf16 (!%p237_p2), %v394_v19, %v393_v17  ;;  %v396_v22 = vld [vmem:[%s762_s5 + $0x28] sm:$0xff] (!%p237_p2)  ;;  %v542_v28 = vld [vmem:[%s758_s1] ss:$0 sm:$0xff] (!%p237_p2)  ;;  %v397_v33 = vld [vmem:[%s762_s5 + $0x30] sm:$0xff] (!%p237_p2) }
   0x9   : > { %597 = vmatprep.subr.bf16.mxu0 (!%p237_p2), %v633_v10  ;;  %602 = vmatpush3.bf16.msra.mxu1 (!%p237_p2), %v601_v18  ;;  %v607_v23 = vpack.c.bf16 (!%p237_p2), %v396_v22, %v395_v21  ;;  %v543_v30 = vld [vmem:[%s759_s2] ss:$0 sm:$0xff] (!%p237_p2)  ;;  %v398_v34 = vld [vmem:[%s762_s5 + $0x38] sm:$0xff] (!%p237_p2) }
   0xa   : > { %603 = vmatprep.subr.bf16.mxu1 (!%p237_p2), %v633_v10  ;;  %v610_v35 = vpack.c.bf16 (!%p237_p2), %v398_v34, %v397_v33  ;;  %v544_v36 = vld [vmem:[%s761_s4] ss:$0 sm:$0xff] (!%p237_p2) }
   0xb   : > { %v546_v41 = vld [vmem:[%s763_s6] ss:$0 sm:$0xff] (!%p237_p2) }
   0xc   : > { %599 = vmatpush3.bf16.msra.mxu0 (!%p237_p2), %v598_v14 }
   0xd   : > { %s766_s25 = smov (!%p266_p3, %s535_s25), 1  ;;  %605 = vmatpush3.bf16.msra.mxu1 %v604_v20 }
   0xe   : > { %s540_s26 = sshll.u32 %s766_s25, 3  ;;  %606 = vmatprep.subr.bf16.mxu1 %v633_v10 }
   0xf   : > { %s269_s29 = scalar_lea.vmem %s757_s0, %s540_s26  ;;  %s273_s21 = scalar_lea.vmem %s764_s7, %s540_s26 }
  0x10   : > { %v692_v0 = vld [vmem:[%s269_s29] sm:$0xff] }
  0x11   : > { %v278_v1 = vsel %vm277_vm0, %v692_v0, 0.0  ;;  %608 = vmatpush3.bf16.msra.mxu1 %v607_v23 }
  0x12   : > { %279 = vadd.xlane.f32.xlu0 %v278_v1  ;;  %609 = vmatprep.subr.bf16.mxu1 %v633_v10 }
  0x15   : > { %611 = vmatpush3.bf16.msra.mxu1 %v610_v35 }
  0x9f   : > { %v280_v2 = vpop.xlane.xlu0 %279 }
  0xa0   : > { %v282_v3 = vmul.f32 0.03125, %v280_v2 }
  0xa2   : > { %v283_v4 = vsub.f32 %v692_v0, %v282_v3 }
  0xa4   : > { %v284_v5 = vmul.f32 %v283_v4, %v283_v4 }
  0xa6   : > { %v285_v6 = vsel %vm277_vm0, %v284_v5, 0.0 }
  0xa7   : > { %286 = vadd.xlane.f32.xlu0 %v285_v6 }
 0x134   : > { %v287_v24 = vpop.xlane.xlu0 %286 }
 0x135   : > { %v288_v25 = vmul.f32 0.03125, %v287_v24 }
 0x137   : > { %v289_v26 = vadd.f32 1e-06, %v288_v25 }
 0x139   : > { %623 = vrsqrt.f32 %v289_v26 }
 0x143   : > { %v624_v27 = vpop.eup %623 }
 0x144   : > { %v291_v29 = vmul.f32 %v624_v27, %v283_v4 }
 0x146   : > { %v298_v31 = vmul.f32 %v542_v28, %v291_v29 }
 0x148   : > { %v305_v32 = vadd.f32 %v543_v30, %v298_v31 }
 0x14a   : > { %573 = vmatmul.mubr.msk.f32.vlgmr.msra.gmra.mrb[0].mxu0 %vm277_vm0, %v305_v32 }
 0x21d   : > { %v386_v37 = vpop.f32.mrb[0].mxu0 }
 0x21e   : > { %v387_v38 = vadd.f32 %v544_v36, %v386_v37  ;;  %v574_v39 = vpop.f32.mrb[1].mxu0 }
 0x220   : > { %v390_v40 = vmax.f32 %v387_v38, 0.0 }
 0x222   : > { %592 = vmatmul.mubr.msk.f32.vlgmr.msra.gmra.mrb[0].mxu1 %vm406_vm2, %v390_v40 }
 0x2f5   : > { %v476_v42 = vpop.f32.mrb[0].mxu1 }
 0x2f6   : > { %v477_v43 = vadd.f32 %v546_v41, %v476_v42  ;;  %v593_v44 = vpop.f32.mrb[1].mxu1 }
 0x2f8   : > { %v480_v45 = vadd.f32 %v477_v43, %v692_v0 }
 0x2fa   : > { %481 = vst.msk [vmem:[%s273_s21] sm:$0xff] %vm277_vm0, %v480_v45 }
 0x2fb PF: > { %s17_s24 = sadd.s32 1, %s631_s24  }
 0x2fc   : > { %p14_p4 = scmp.ge.s32.totalorder %s17_s24, 4  }
 0x2fe   :  { %16 = sbr.rel (!%p14_p4) target bundleno = 1 (0x1), region = 78 }

// kernel: forward.21
= control target key start
LH: loop header
LB: loop body
LE: loop exit
PB: predicated region body
PF: predicated region fallthrough
CT: control target
= control target key end

     0   :  { %vm33_vm0 = vcmask 261120   ;;  %v260_v6 = vmov 0   ;;  %s339_s0 = inlined_call_operand.vmem [shape: f32[16,32], index: 0, kind: input, shape index: {}]   ;;  %s340_s1 = inlined_call_operand.vmem [shape: f32[32,128], index: 1, kind: input, shape index: {}]   ;;  %s341_s2 = inlined_call_operand.vmem [shape: f32[1,128], index: 2, kind: input, shape index: {}]   ;;  %s342_s3 = inlined_call_operand.vmem [shape: s32[16,1], index: 3, kind: input, shape index: {}]   ;;  %s343_s4 = inlined_call_operand.vmem [shape: f32[16,128], index: 4, kind: output, shape index: {0}]   ;;  %s344_s5 = inlined_call_operand.hbm [shape: f32[1,1], index: 5, kind: output, shape index: {1}]  }
   0x1   :  { %v22_v0 = vld [vmem:[%s340_s1] sm:$0xff]  ;;  %v23_v1 = vld [vmem:[%s340_s1 + $0x8] sm:$0xff]  ;;  %v24_v2 = vld [vmem:[%s340_s1 + $0x10] sm:$0xff]  ;;  %226 = vset.pattern.permute.xlu1 %v260_v6  ;;  %227 = vset.pattern.permute.xlu0 %v260_v6 }
   0x2   :  { %v214_v3 = vpack.c.bf16 %v23_v1, %v22_v0  ;;  %v25_v4 = vld [vmem:[%s340_s1 + $0x18] sm:$0xff]  ;;  %v20_v5 = vld [vmem:[%s339_s0] sm:$0xff] }
   0x3   :  { %v218_v7 = vpack.c.bf16 %v25_v4, %v24_v2  ;;  %211 = vmatprep.mubr.msk.f32.mxu0 %vm33_vm0, %v20_v5  ;;  %v137_v8 = vld [vmem:[%s342_s3] sm:$0xff] }
   0x4   :  { %11 = vsyncpa [#allocation3], 0  ;;  %215 = vmatprep.subr.bf16.mxu0 %v214_v3  ;;  %142 = vperm.xlu1 %226, %v137_v8   ;;  %v138_v9 = vld [vmem:[%s342_s3 + $0x8] sm:$0xff]  ;;  %v194_v11 = vld [vmem:[%s341_s2] ss:$0 sm:$0xff]  ;;  %v139_v22 = vlaneseq  ;;  %vm157_vm3 = vcmask 7168  }
   0x5   :  { %217 = vmatpush3.bf16.msra.mxu0 %v214_v3  ;;  %v21_v10 = vld [vmem:[%s339_s0 + $0x8] sm:$0xff]  ;;  %s261_s0 = smov [#allocation2]   ;;  %vm174_vm4 = vcmask 0  }
   0x6   :  { %219 = vmatprep.subr.bf16.mxu0 %v218_v7  ;;  %v140_v24 = vand.u32 127, %v139_v22  ;;  %s184_s2 = sshll.u32 %s261_s0, 4  ;;  %s185_s2 = int_to_ptr.vmem [resolvable:$true] %s184_s2 }
   0x7   :  { %s236_s14 = scalar_lea.vmem %s185_s2, 16  ;;  %s240_s15 = scalar_lea.vmem %s185_s2, 32 }
   0x8   :  { %145 = vperm.xlu1 %226, %v138_v9   ;;  %p237_p0 = scmp.ne.s32.totalorder %s185_s2, %s236_s14  ;;  %p241_p1 = scmp.lt.s32.totalorder %s185_s2, %s185_s2 }
   0x9   :  { %221 = vmatpush3.bf16.msra.mxu0 %v218_v7  ;;  %p242_p2 = scmp.lt.s32.totalorder %s240_s15, %s236_s14 }
   0xb   :  { %p243_p3 = por %p242_p2, %p241_p1 }
   0xc   :  { %212 = vmatmul.mubr.msk.f32.vlgmr.msra.gmra.mrb[0].mxu0 %vm33_vm0, %v21_v10 }
   0xd   :  { %p244_p4 = pnand %p243_p3, %p237_p0 }
  0x83   :  { %v143_v23 = vpop.permute.xlu1 %142 }
  0x84   :  { %vm147_vm1 = vcmp.eq.s32.totalorder %v140_v24, %v143_v23 }
  0x87   :  { %v146_v26 = vpop.permute.xlu1 %145 }
  0x88   :  { %vm148_vm2 = vcmp.eq.s32.totalorder %v140_v24, %v146_v26 }
  0xdf   :  { %v213_v12 = vpop.f32.mrb[0].mxu0 }
  0xe0   :  { %v112_v13 = vadd.f32 %v213_v12, %v194_v11  ;;  %v106_v14 = vpop.f32.mrb[1].mxu0 }
  0xe1   :  { %v107_v15 = vadd.f32 %v194_v11, %v106_v14 }
  0xe2   :  { %116 = vst [vmem:[%s343_s4 + $0x8] sm:$0xff] %v112_v13  ;;  %v150_v29 = vsel %vm148_vm2, %v112_v13, 0.0 }
  0xe3   :  { %115 = vst [vmem:[%s343_s4] sm:$0xff] %v107_v15  ;;  %117 = vmax.xlane.f32.xlu0 %v107_v15  ;;  %v149_v28 = vsel %vm147_vm1, %v107_v15, 0.0 }
  0xe7   :  { %119 = vmax.xlane.f32.xlu0 %v112_v13 }
 0x170   :  { %v118_v16 = vpop.xlane.xlu0 %117 }
 0x171   :  { %v121_v17 = vsub.f32 %v107_v15, %v118_v16 }
 0x173   :  { %v123_v18 = vmul.f32 1.442695, %v121_v17 }
 0x174   :  { %v120_v19 = vpop.xlane.xlu0 %119 }
 0x175   :  { %228 = vpow2.f32 %v123_v18  ;;  %v122_v20 = vsub.f32 %v112_v13, %v120_v19 }
 0x177   :  { %v125_v21 = vmul.f32 1.442695, %v122_v20 }
 0x179   :  { %230 = vpow2.f32 %v125_v21 }
 0x17f   :  { %v229_v25 = vpop.eup %228 }
 0x180   :  { %127 = vadd.xlane.f32.xlu0 %v229_v25 }
 0x183   :  { %v231_v27 = vpop.eup %230 }
 0x184   :  { %129 = vadd.xlane.f32.xlu1 %v231_v27  ;;  %151 = vadd.xlane.f32.xlu0 %v149_v28 }
 0x188   :  { %153 = vadd.xlane.f32.xlu0 %v150_v29 }
 0x20d   :  { %v128_v30 = vpop.xlane.xlu0 %127 }
 0x20e   :  { %232 = vlog2.f32 %v128_v30 }
 0x211   :  { %v130_v31 = vpop.xlane.xlu1 %129  ;;  %v152_v34 = vpop.xlane.xlu0 %151 }
 0x212   :  { %234 = vlog2.f32 %v130_v31 }
 0x215   :  { %v154_v40 = vpop.xlane.xlu0 %153 }
 0x218   :  { %v233_v32 = vpop.eup %232 }
 0x219   :  { %v132_v33 = vmul.f32 0.6931472, %v233_v32 }
 0x21b   :  { %v135_v35 = vadd.f32 %v132_v33, %v118_v16 }
 0x21c   :  { %v235_v36 = vpop.eup %234 }
 0x21d   :  { %v134_v37 = vmul.f32 0.6931472, %v235_v36  ;;  %v155_v38 = vsub.f32 %v135_v35, %v152_v34 }
 0x21f   :  { %v136_v39 = vadd.f32 %v134_v37, %v120_v19  ;;  %v158_v42 = vsel %vm157_vm3, %v155_v38, 0.0 }
 0x221   :  { %v156_v41 = vsub.f32 %v136_v39, %v154_v40 }
 0x223   :  { %v159_v43 = vsel %vm157_vm3, %v156_v41, 0.0 }
 0x224   :  { %v160_v44 = vadd.f32 %v159_v43, %v158_v42 }
 0x226   :  { %161 = vadd.xlane.f32.xlu0 %v160_v44 }
 0x2b3   :  { %v162_v45 = vpop.xlane.xlu0 %161 }
 0x2b4   :  { %v163_v46 = vrot.slane %v162_v45, 4 }
 0x2b6   :  { %v164_v47 = vadd.f32 %v163_v46, %v162_v45 }
 0x2b8   :  { %v165_v48 = vrot.slane %v164_v47, 2 }
 0x2ba   :  { %v166_v49 = vadd.f32 %v165_v48, %v164_v47 }
 0x2bc   :  { %v167_v50 = vrot.slane %v166_v49, 1 }
 0x2be   :  { %v168_v51 = vadd.f32 %v167_v50, %v166_v49 }
 0x2c0   :  { %222 = vpush %v168_v51 }
 0x2f1   :  { %s223_s4 = spop %222 }
 0x2f2   :  { %s172_s13 = smul.f32 0.0625, %s223_s4 }
 0x2f4   :  { %v173_v52 = vstv %s172_s13 }
 0x2f5   :  { %175 = vst.msk [vmem:[#allocation2] sm:$0x1] %vm174_vm4, %v173_v52 }
 0x2f6   :  { %247 = shalt.err (!%p244_p4)
}
 0x2f7   :  { %s248_s18 = scalar_lea.hbm %s344_s5, 16 }
 0x2f8   :  { %p249_p5 = scmp.ne.s32.totalorder %s344_s5, %s248_s18  ;;  %p252_p6 = scmp.lt.u32.totalorder %s248_s18, %s344_s5 }
 0x2fa   :  { %p254_p7 = pnand %p252_p6, %p249_p5 }
 0x2fc   :  { %257 = shalt.err (!%p254_p7)
}
 0x2fd   :  { %187 = dma.vmem_to_hbm [thread:$0]  %s185_s2, 16, %s344_s5, [#allocation3]  }
 0x2fe   :  { %258 = dma.done.wait [#allocation3], 16  }
 0x2ff   :  { %259 = vsyncadd [#allocation3], 4294967280 }
 0x300   :  { %193 = vsyncpa [#allocation3], 1 }

// kernel: forward.11
= control target key start
LH: loop header
LB: loop body
LE: loop exit
PB: predicated region body
PF: predicated region fallthrough
CT: control target
= control target key end

     0   :  { %s1512_s27 = smov 0   ;;  %s1653_s0 = inlined_call_operand.vmem [shape: f32[2,8,32], index: 0, kind: input, shape index: {}]   ;;  %s1654_s1 = inlined_call_operand.vmem [shape: f32[2,8,8], index: 1, kind: input, shape index: {}]   ;;  %s1655_s2 = inlined_call_operand.vmem [shape: f32[1,32], index: 2, kind: input, shape index: {}]   ;;  %s1656_s3 = inlined_call_operand.vmem [shape: f32[1,32], index: 3, kind: input, shape index: {}]   ;;  %s1657_s4 = inlined_call_operand.vmem [shape: f32[32,96], index: 4, kind: input, shape index: {}]   ;;  %s1658_s5 = inlined_call_operand.vmem [shape: f32[1,96], index: 5, kind: input, shape index: {}]   ;;  %s1659_s6 = inlined_call_operand.vmem [shape: f32[32,32], index: 6, kind: input, shape index: {}]   ;;  %s1660_s7 = inlined_call_operand.vmem [shape: f32[1,32], index: 7, kind: input, shape index: {}]   ;;  %s1661_s8 = inlined_call_operand.vmem [shape: f32[2,8,32], index: 8, kind: output, shape index: {}]  }
   0x1 LB: > { %s1271_s28 = sadd.s32 4294967295, %s1448_s27   ;;  %p1275_p0 = scmp.ge.s32.totalorder %s1448_s27, 1  ;;  %s1448_s27 = sphi %s1512_s27, %s18_s27  }
   0x2   : > { %p270_p1 = scmp.lt.s32.totalorder %s1448_s27, 3 }
   0x4   : > { %p271_p2 = pnand %p1275_p0, %p270_p1 }
   0x5   : > { %p306_p3 = scmp.lt.s32.totalorder (!%p271_p2), %s1271_s28, 1  ;;  %vm321_vm0 = vcmask (!%p271_p2), 261120   ;;  %v350_v7 = vld [vmem:[%s1657_s4] sm:$0xff] (!%p271_p2)  ;;  %v351_v8 = vld [vmem:[%s1657_s4 + $0x8] sm:$0xff] (!%p271_p2)  ;;  %v352_v9 = vld [vmem:[%s1657_s4 + $0x10] sm:$0xff] (!%p271_p2)  ;;  %v1450_v10 = vmov (!%p271_p2), 0.0|0.0  }
   0x6   : > { %274 = sbr.rel (%p271_p2) target bundleno = 2279 (0x8e7), region = 52  ;;  %1387 = vmatprep.subr.bf16.mxu0 (!%p271_p2), %v1450_v10  ;;  %v1388_v11 = vpack.c.bf16 (!%p271_p2), %v351_v8, %v350_v7  ;;  %v353_v12 = vld [vmem:[%s1657_s4 + $0x18] sm:$0xff] (!%p271_p2)  ;;  %vm1451_vm1 = vmmov (!%p271_p2), 0   ;;  %v1452_v13 = vmov (!%p271_p2), 0.0   ;;  %v1279_v19 = vld [vmem:[%s1655_s2] ss:$0 sm:$0xff] (!%p271_p2) }
   0x7   : > { %1333 = vmatprep.mubr.msk.f32.mxu0 (!%p271_p2), %vm1451_vm1, %v1452_v13  ;;  %1336 = vmatprep.subr.mxu1 (!%p271_p2), %v1452_v13  ;;  %v1391_v14 = vpack.c.bf16 (!%p271_p2), %v353_v12, %v352_v9  ;;  %v1280_v21 = vld [vmem:[%s1656_s3] ss:$0 sm:$0xff] (!%p271_p2)  ;;  %s1453_s25 = smov (!%p271_p2), 64   ;;  %s1454_s26 = smov (!%p271_p2), 96   ;;  %vm438_vm2 = vcmask (!%p271_p2), 64512   ;;  %vm1116_vm3 = vcmask (!%p271_p2), 130048  }
   0x8   : > { %1338 = vmatprep.mubr.msk.f32.mxu1 (!%p271_p2), %vm1451_vm1, %v1452_v13  ;;  %1389 = vmatpush3.bf16.msra.mxu0 (!%p271_p2), %v1388_v11  ;;  %v1281_v24 = vld [vmem:[%s1658_s5] ss:$0 sm:$0xff] (!%p271_p2)  ;;  %s1456_s30 = smov (!%p271_p2), 120   ;;  %s1457_s12 = smov (!%p271_p2), 80   ;;  %vm1118_vm4 = vcmask (!%p271_p2), 195584  }
   0x9   : > { %1390 = vmatprep.subr.bf16.mxu0 (!%p271_p2), %v1450_v10  ;;  %s1458_s13 = smov (!%p271_p2), 112   ;;  %s1459_s14 = smov (!%p271_p2), 72  }
   0xa   : > { %s1460_s15 = smov (!%p271_p2), 104   ;;  %s1461_s16 = smov (!%p271_p2), 48  }
   0xb   : > { %s1462_s17 = smov (!%p271_p2), 56   ;;  %s1463_s18 = smov (!%p271_p2), 40  }
   0xc   : > { %1392 = vmatpush3.bf16.msra.mxu0 (!%p271_p2), %v1391_v14  ;;  %s1466_s9 = smov (!%p271_p2), 24  }
   0xd   : > { %s1663_s28 = smov (!%p306_p3, %s1271_s28), 1  ;;  %1356 = vmatprep.subr.mxu0 %v1452_v13 }
   0xe   : > { %s1520_s29 = sshll.u32 %s1663_s28, 3  ;;  %s1455_s28 = smov 88  }
   0xf   : > { %s309_s10 = scalar_lea.vmem %s1653_s0, %s1520_s29  ;;  %s313_s11 = scalar_lea.vmem %s1654_s1, %s1520_s29 }
  0x10   : > { %v1526_v0 = vld [vmem:[%s309_s10] sm:$0xff] }
  0x11   : > { %v322_v1 = vsel %vm321_vm0, %v1526_v0, 0.0  ;;  %v434_v31 = vld [vmem:[%s313_s11] sm:$0xff] }
  0x12   : > { %323 = vadd.xlane.f32.xlu0 %v322_v1 }
  0x9f   : > { %v324_v2 = vpop.xlane.xlu0 %323 }
  0xa0   : > { %v326_v3 = vmul.f32 0.03125, %v324_v2 }
  0xa2   : > { %v327_v4 = vsub.f32 %v1526_v0, %v326_v3 }
  0xa4   : > { %v328_v5 = vmul.f32 %v327_v4, %v327_v4 }
  0xa6   : > { %v329_v6 = vsel %vm321_vm0, %v328_v5, 0.0 }
  0xa7   : > { %330 = vadd.xlane.f32.xlu0 %v329_v6 }
 0x134   : > { %v331_v15 = vpop.xlane.xlu0 %330 }
 0x135   : > { %v332_v16 = vmul.f32 0.03125, %v331_v15 }
 0x137   : > { %v333_v17 = vadd.f32 1e-06, %v332_v16 }
 0x139   : > { %1424 = vrsqrt.f32 %v333_v17 }
 0x143   : > { %v1425_v18 = vpop.eup %1424 }
 0x144   : > { %v335_v20 = vmul.f32 %v1425_v18, %v327_v4 }
 0x146   : > { %v342_v22 = vmul.f32 %v1279_v19, %v335_v20 }
 0x148   : > { %v349_v23 = vadd.f32 %v1280_v21, %v342_v22 }
 0x14a   : > { %1334 = vmatmul.mubr.msk.f32.vlgmr.msra.gmra.mrb[0].mxu0 %vm321_vm0, %v349_v23 }
 0x14b   : > { %1358 = vmatprep.mubr.msk.f32.mxu0 %vm1451_vm1, %v1452_v13 }
 0x21d   : > { %v430_v25 = vpop.f32.mrb[0].mxu0 }
 0x21e   : > { %v1564_v26 = vadd.f32 %v1281_v24, %v430_v25  ;;  %v1335_v27 = vpop.f32.mrb[1].mxu0 }
 0x220   : > { %526 = vrot.lane.b32.xlu0 %v1564_v26, %s1453_s25  ;;  %436 = vrot.lane.b32.xlu1 %v1564_v26, %s1454_s26 }
 0x224   : > { %604 = vrot.lane.b32.xlu0 %v1564_v26, %s1455_s28  ;;  %s1464_s28 = smov 8  }
 0x228   : > { %602 = vrot.lane.b32.xlu0 %v1564_v26, %s1456_s30  ;;  %s1465_s30 = smov 16  }
 0x292   : > { %v437_v28 = vpop.permute.xlu1 %436  ;;  %v527_v29 = vpop.permute.xlu0 %526 }
 0x293   : > { %1337 = vmatpush3.xpose.msk.msra.mxu1 %vm438_vm2, %v437_v28 }
 0x294   : > { %1341 = vmatprep.subr.mxu1 %v1452_v13 }
 0x296   : > { %1339 = vmatmul.mubr.msk.f32.vlgmr.msra.gmra.mrb[0].mxu1 %vm438_vm2, %v1564_v26  ;;  %v605_v42 = vpop.permute.xlu0 %604 }
 0x297   : > { %1342 = vmatpush3.msra.mxu1 %v527_v29  ;;  %1343 = vmatprep.mubr.msk.f32.mxu1 %vm1451_vm1, %v1452_v13 }
 0x298   : > { %1346 = vmatprep.subr.mxu1 %v1452_v13 }
 0x29a   : > { %v603_v43 = vpop.permute.xlu0 %602 }
 0x369   : > { %v509_v30 = vpop.f32.mrb[0].mxu1 }
 0x36a   : > { %v513_v32 = vmul.f32 0.35355338, %v509_v30  ;;  %v1340_v33 = vpop.f32.mrb[1].mxu1 }
 0x36b   : > { %v1120_v33 = vld [vmem:[%s1659_s6] sm:$0xff] }
 0x36c   : > { %v514_v34 = vadd.f32 %v513_v32, %v434_v31 }
 0x36e   : > { %v515_v35 = vsel %vm438_vm2, %v514_v34, -inf }
 0x36f   : > { %516 = vmax.xlane.f32.xlu1 %v515_v35 }
 0x380   : > { %771 = vrot.lane.b32.xlu1 %v1564_v26, %s1457_s12 }
 0x3fc   : > { %v517_v36 = vpop.xlane.xlu1 %516 }
 0x3fd   : > { %v518_v37 = vsub.f32 %v514_v34, %v517_v36  ;;  %v1121_v34 = vld [vmem:[%s1659_s6 + $0x8] sm:$0xff]  ;;  %v1122_v36 = vld [vmem:[%s1659_s6 + $0x10] sm:$0xff] }
 0x3fe   : > { %v1394_v35 = vpack.c.bf16 %v1121_v34, %v1120_v33 }
 0x3ff   : > { %v519_v38 = vmul.f32 1.442695, %v518_v37 }
 0x400   : > { %v772_v39 = vpop.permute.xlu1 %771 }
 0x401   : > { %1426 = vpow2.f32 %v519_v38  ;;  %1357 = vmatpush3.xpose.msk.msra.mxu0 %vm438_vm2, %v772_v39 }
 0x402   : > { %1366 = vmatprep.subr.mxu0 %v1452_v13 }
 0x40b   : > { %v1427_v40 = vpop.eup %1426 }
 0x40c   : > { %v521_v41 = vsel %vm438_vm2, %v1427_v40, 0.0 }
 0x40d   : > { %522 = vadd.xlane.f32.xlu0 %v521_v41 }
 0x423   : > { %769 = vrot.lane.b32.xlu0 %v1564_v26, %s1458_s13 }
 0x427   : > { %938 = vrot.lane.b32.xlu0 %v1564_v26, %s1459_s14  ;;  %s317_s14 = scalar_lea.vmem %s1661_s8, %s1520_s29 }
 0x42b   : > { %936 = vrot.lane.b32.xlu0 %v1564_v26, %s1460_s15 }
 0x49a   : > { %v523_v44 = vpop.xlane.xlu0 %522 }
 0x49b   : > { %1428 = vrcp.f32 %v523_v44 }
 0x49e   : > { %v770_v45 = vpop.permute.xlu0 %769 }
 0x49f   : > { %1359 = vmatmul.mubr.msk.f32.vlgmr.msra.gmra.mrb[2].mxu0 %vm438_vm2, %v770_v45 }
 0x4a0   : > { %1368 = vmatprep.mubr.msk.f32.mxu0 %vm1451_vm1, %v1452_v13 }
 0x4a2   : > { %v939_v46 = vpop.permute.xlu0 %938 }
 0x4a3   : > { %1367 = vmatpush3.xpose.msk.msra.mxu0 %vm438_vm2, %v939_v46 }
 0x4a4   : > { %1393 = vmatprep.subr.bf16.mxu0 %v1450_v10 }
 0x4a5   : > { %v1429_v47 = vpop.eup %1428 }
 0x4a6   : > { %v525_v48 = vmul.f32 %v1429_v47, %v1427_v40  ;;  %v937_v49 = vpop.permute.xlu0 %936 }
 0x4a7   : > { %1369 = vmatmul.mubr.msk.f32.vlgmr.msra.gmra.mrb[4].mxu0 %vm438_vm2, %v937_v49  ;;  %v1295_v49 = vld [vmem:[%s1660_s7] ss:$0 sm:$0xff] }
 0x4a8   : > { %1344 = vmatmul.mubr.msk.f32.vlgmr.msra.gmra.mrb[2].mxu1 %vm438_vm2, %v525_v48  ;;  %1384 = vmatprep.mubr.msk.f32.mxu0 %vm1451_vm1, %v1452_v13 }
 0x4a9   : > { %1347 = vmatpush3.xpose.msk.msra.mxu1 %vm438_vm2, %v605_v42  ;;  %1348 = vmatprep.mubr.msk.f32.mxu1 %vm1451_vm1, %v1452_v13 }
 0x4aa   : > { %1351 = vmatprep.subr.mxu1 %v1452_v13  ;;  %1395 = vmatpush3.bf16.msra.mxu0 %v1394_v35 }
 0x4ab   : > { %1396 = vmatprep.subr.bf16.mxu0 %v1450_v10 }
 0x4ac   : > { %1349 = vmatmul.mubr.msk.f32.vlgmr.msra.gmra.mrb[4].mxu1 %vm438_vm2, %v603_v43 }
 0x4ad   : > { %1353 = vmatprep.mubr.msk.f32.mxu1 %vm1451_vm1, %v1452_v13 }
 0x572   : > { %v843_v50 = vpop.f32.mrb[2].mxu0 }
 0x573   : > { %v847_v51 = vmul.f32 0.35355338, %v843_v50  ;;  %v1360_v52 = vpop.f32.mrb[3].mxu0 }
 0x575   : > { %v848_v53 = vadd.f32 %v847_v51, %v434_v31 }
 0x577   : > { %v849_v54 = vsel %vm438_vm2, %v848_v53, -inf }
 0x578   : > { %850 = vmax.xlane.f32.xlu1 %v849_v54 }
 0x57a   : > { %v1010_v55 = vpop.f32.mrb[4].mxu0 }
 0x57b   : > { %v1606_v56 = vpop.f32.mrb[2].mxu1  ;;  %v1370_v57 = vpop.f32.mrb[5].mxu0  ;;  %v1014_v60 = vmul.f32 0.35355338, %v1010_v55 }
 0x57c   : > { %v1345_v58 = vpop.f32.mrb[3].mxu1 }
 0x57d   : > { %v1015_v2 = vadd.f32 %v1014_v60, %v434_v31 }
 0x57f   : > { %v676_v59 = vpop.f32.mrb[4].mxu1  ;;  %v1016_v3 = vsel %vm438_vm2, %v1015_v2, -inf }
 0x580   : > { %v680_v61 = vmul.f32 0.35355338, %v676_v59  ;;  %v1350_v62 = vpop.f32.mrb[5].mxu1 }
 0x582   : > { %v681_v63 = vadd.f32 %v680_v61, %v434_v31 }
 0x584   : > { %v682_v1 = vsel %vm438_vm2, %v681_v63, -inf }
 0x585   : > { %683 = vmax.xlane.f32.xlu0 %v682_v1 }
 0x589   : > { %1017 = vmax.xlane.f32.xlu0 %v1016_v3 }
 0x605   : > { %v851_v4 = vpop.xlane.xlu1 %850 }
 0x606   : > { %v852_v5 = vsub.f32 %v848_v53, %v851_v4 }
 0x608   : > { %v853_v6 = vmul.f32 1.442695, %v852_v5 }
 0x60a   : > { %1430 = vpow2.f32 %v853_v6 }
 0x612   : > { %v684_v7 = vpop.xlane.xlu0 %683 }
 0x613   : > { %v685_v8 = vsub.f32 %v681_v63, %v684_v7 }
 0x614   : > { %v1431_v9 = vpop.eup %1430 }
 0x615   : > { %v686_v11 = vmul.f32 1.442695, %v685_v8  ;;  %v855_v12 = vsel %vm438_vm2, %v1431_v9, 0.0 }
 0x616   : > { %856 = vadd.xlane.f32.xlu0 %v855_v12  ;;  %v1018_v14 = vpop.xlane.xlu0 %1017 }
 0x617   : > { %1432 = vpow2.f32 %v686_v11  ;;  %v1019_v15 = vsub.f32 %v1015_v2, %v1018_v14 }
 0x619   : > { %v1020_v16 = vmul.f32 1.442695, %v1019_v15 }
 0x61b   : > { %1434 = vpow2.f32 %v1020_v16 }
 0x621   : > { %v1433_v17 = vpop.eup %1432 }
 0x622   : > { %v688_v18 = vsel %vm438_vm2, %v1433_v17, 0.0 }
 0x623   : > { %689 = vadd.xlane.f32.xlu0 %v688_v18 }
 0x625   : > { %v1435_v19 = vpop.eup %1434 }
 0x626   : > { %v1022_v20 = vsel %vm438_vm2, %v1435_v19, 0.0 }
 0x627   : > { %1023 = vadd.xlane.f32.xlu1 %v1022_v20 }
 0x638   : > { %860 = vrot.lane.b32.xlu1 %v1564_v26, %s1461_s16 }
 0x639   : > { %693 = vrot.lane.b32.xlu0 %v1564_v26, %s1462_s17 }
 0x63c   : > { %1027 = vrot.lane.b32.xlu1 %v1564_v26, %s1463_s18 }
 0x6a3   : > { %v857_v21 = vpop.xlane.xlu0 %856 }
 0x6b0   : > { %v690_v22 = vpop.xlane.xlu0 %689 }
 0x6b1   : > { %1436 = vrcp.f32 %v690_v22 }
 0x6b2   : > { %1438 = vrcp.f32 %v857_v21 }
 0x6b4   : > { %v1024_v23 = vpop.xlane.xlu1 %1023  ;;  %v694_v24 = vpop.permute.xlu0 %693 }
 0x6b5   : > { %1352 = vmatpush3.msra.mxu1 %v694_v24  ;;  %1440 = vrcp.f32 %v1024_v23 }
 0x6b6   : > { %1361 = vmatprep.subr.mxu1 %v1452_v13 }
 0x6b8   : > { %v861_v28 = vpop.permute.xlu1 %860 }
 0x6bb   : > { %v1437_v25 = vpop.eup %1436 }
 0x6bc   : > { %v692_v27 = vmul.f32 %v1437_v25, %v1433_v17  ;;  %v1439_v29 = vpop.eup %1438  ;;  %v1028_v31 = vpop.permute.xlu1 %1027 }
 0x6bd   : > { %v859_v26 = vmul.f32 %v1439_v29, %v1431_v9 }
 0x6be   : > { %1354 = vmatmul.mubr.msk.f32.vlgmr.msra.gmra.mrb[6].mxu1 %vm438_vm2, %v692_v27 }
 0x6bf   : > { %1362 = vmatpush3.msra.mxu1 %v861_v28  ;;  %1363 = vmatprep.mubr.msk.f32.mxu1 %vm1451_vm1, %v1452_v13  ;;  %v1441_v30 = vpop.eup %1440 }
 0x6c0   : > { %1371 = vmatprep.subr.mxu1 %v1452_v13  ;;  %v1026_v32 = vmul.f32 %v1441_v30, %v1435_v19 }
 0x6c2   : > { %1364 = vmatmul.mubr.msk.f32.vlgmr.msra.gmra.mrb[8].mxu1 %vm438_vm2, %v859_v26 }
 0x6c3   : > { %1372 = vmatpush3.msra.mxu1 %v1028_v31  ;;  %1373 = vmatprep.mubr.msk.f32.mxu1 %vm1451_vm1, %v1452_v13  ;;  %v1123_v13 = vld [vmem:[%s1659_s6 + $0x18] sm:$0xff] }
 0x6c4   : > { %v1397_v37 = vpack.c.bf16 %v1123_v13, %v1122_v36 }
 0x6c6   : > { %1374 = vmatmul.mubr.msk.f32.vlgmr.msra.gmra.mrb[10].mxu1 %vm438_vm2, %v1026_v32  ;;  %1398 = vmatpush3.bf16.msra.mxu0 %v1397_v37 }
 0x791   : > { %v765_v38 = vpop.f32.mrb[6].mxu1 }
 0x792   : > { %1104 = vrot.lane.b32.xlu1 %v765_v38, %s1464_s28  ;;  %v1355_v39 = vpop.f32.mrb[7].mxu1 }
 0x795   : > { %v932_v40 = vpop.f32.mrb[8].mxu1 }
 0x796   : > { %1108 = vrot.lane.b32.xlu0 %v932_v40, %s1465_s30  ;;  %v1365_v41 = vpop.f32.mrb[9].mxu1 }
 0x799   : > { %v1099_v42 = vpop.f32.mrb[10].mxu1 }
 0x79a   : > { %1112 = vrot.lane.b32.xlu1 %v1099_v42, %s1466_s9  ;;  %v1375_v10 = vpop.f32.mrb[11].mxu1 }
 0x804   : > { %v1105_v43 = vpop.permute.xlu1 %1104 }
 0x805   : > { %v1115_v45 = vsel %vm438_vm2, %v1606_v56, %v1105_v43 }
 0x808   : > { %v1109_v44 = vpop.permute.xlu0 %1108 }
 0x809   : > { %v1117_v46 = vsel %vm1116_vm3, %v1115_v45, %v1109_v44 }
 0x80c   : > { %v1113_v47 = vpop.permute.xlu1 %1112 }
 0x80d   : > { %v1119_v48 = vsel %vm1118_vm4, %v1117_v46, %v1113_v47 }
 0x80e   : > { %1385 = vmatmul.mubr.msk.f32.vlgmr.msra.gmra.mrb[6].mxu0 %vm321_vm0, %v1119_v48 }
 0x8e1   : > { %v1200_v50 = vpop.f32.mrb[6].mxu0 }
 0x8e2   : > { %v1201_v51 = vadd.f32 %v1295_v49, %v1200_v50  ;;  %v1386_v52 = vpop.f32.mrb[7].mxu0 }
 0x8e4   : > { %v1204_v53 = vadd.f32 %v1201_v51, %v1526_v0 }
 0x8e6   : > { %1205 = vst.msk [vmem:[%s317_s14] sm:$0xff] %vm321_vm0, %v1204_v53 }
 0x8e7 PF: > { %s18_s27 = sadd.s32 1, %s1448_s27  }
 0x8e8   : > { %p15_p4 = scmp.ge.s32.totalorder %s18_s27, 4  }
 0x8ea   :  { %17 = sbr.rel (!%p15_p4) target bundleno = 1 (0x1), region = 85 }

// kernel: forward.16
= control target key start
LH: loop header
LB: loop body
LE: loop exit
PB: predicated region body
PF: predicated region fallthrough
CT: control target
= control target key end

     0   :  { %s1691_s30 = smov 0   ;;  %s1838_s0 = inlined_call_operand.vmem [shape: f32[2,8,32], index: 0, kind: input, shape index: {}]   ;;  %s1839_s1 = inlined_call_operand.vmem [shape: f32[2,8,32], index: 1, kind: input, shape index: {}]   ;;  %s1840_s2 = inlined_call_operand.vmem [shape: f32[2,8,8], index: 2, kind: input, shape index: {}]   ;;  %s1841_s3 = inlined_call_operand.vmem [shape: f32[1,32], index: 3, kind: input, shape index: {}]   ;;  %s1842_s4 = inlined_call_operand.vmem [shape: f32[1,32], index: 4, kind: input, shape index: {}]   ;;  %s1843_s5 = inlined_call_operand.vmem [shape: f32[32,96], index: 5, kind: input, shape index: {}]   ;;  %s1844_s6 = inlined_call_operand.vmem [shape: f32[1,96], index: 6, kind: input, shape index: {}]   ;;  %s1845_s7 = inlined_call_operand.vmem [shape: f32[32,32], index: 7, kind: input, shape index: {}]   ;;  %s1846_s8 = inlined_call_operand.vmem [shape: f32[1,32], index: 8, kind: input, shape index: {}]   ;;  %s1847_s9 = inlined_call_operand.vmem [shape: f32[2,8,32], index: 9, kind: output, shape index: {}]  }
   0x1 LB: > { %s1419_s10 = sadd.s32 4294967295, %s1626_s30   ;;  %p1423_p0 = scmp.ge.s32.totalorder %s1626_s30, 1  ;;  %s1626_s30 = sphi %s1691_s30, %s19_s30  }
   0x2   : > { %p304_p1 = scmp.lt.s32.totalorder %s1626_s30, 3 }
   0x4   : > { %p305_p2 = pnand %p1423_p0, %p304_p1 }
   0x5   : > { %p346_p3 = scmp.lt.s32.totalorder (!%p305_p2), %s1419_s10, 1  ;;  %vm365_vm0 = vcmask (!%p305_p2), 261120   ;;  %v394_v2 = vld [vmem:[%s1843_s5] sm:$0xff] (!%p305_p2)  ;;  %v395_v3 = vld [vmem:[%s1843_s5 + $0x8] sm:$0xff] (!%p305_p2)  ;;  %v396_v4 = vld [vmem:[%s1843_s5 + $0x10] sm:$0xff] (!%p305_p2)  ;;  %v1628_v7 = vmov (!%p305_p2), 0.0|0.0  }
   0x6   : > { %308 = sbr.rel (%p305_p2) target bundleno = 1742 (0x6ce), region = 56  ;;  %v1592_v5 = vpack.i.bf16 (!%p305_p2), %v395_v3, %v394_v2  ;;  %v397_v6 = vld [vmem:[%s1843_s5 + $0x18] sm:$0xff] (!%p305_p2)  ;;  %1559 = vmatprep.subr.bf16.mxu1 (!%p305_p2), %v1628_v7  ;;  %1553 = vmatprep.subr.bf16.mxu0 (!%p305_p2), %v1628_v7  ;;  %s1629_s23 = smov (!%p305_p2), 96   ;;  %vm1630_vm1 = vmmov (!%p305_p2), 0   ;;  %v1631_v22 = vmov (!%p305_p2), 0.0   ;;  %v1554_v24 = vpack.c.bf16 (!%p305_p2), %v395_v3, %v394_v2 }
   0x7   : > { %v1597_v8 = vpack.i.bf16 (!%p305_p2), %v397_v6, %v396_v4  ;;  %1499 = vmatprep.mubr.msk.f32.mxu1 (!%p305_p2), %vm1630_vm1, %v1631_v22  ;;  %1488 = vmatprep.mubr.msk.f32.mxu0 (!%p305_p2), %vm1630_vm1, %v1631_v22  ;;  %v1557_v25 = vpack.c.bf16 (!%p305_p2), %v397_v6, %v396_v4  ;;  %v1430_v26 = vld [vmem:[%s1844_s6] ss:$0 sm:$0xff] (!%p305_p2)  ;;  %vm572_vm2 = vcmask (!%p305_p2), 64512   ;;  %s1633_s15 = smov (!%p305_p2), 112   ;;  %s1634_s16 = smov (!%p305_p2), 104   ;;  %vm1252_vm3 = vcmask (!%p305_p2), 130048  }
   0x8   : > { %1593 = vrot.lane.b32.xlu1 (!%p305_p2), %v1592_v5, %s1629_s23  ;;  %1555 = vmatpush3.bf16.msra.mxu0 (!%p305_p2), %v1554_v24  ;;  %v1428_v31 = vld [vmem:[%s1841_s3] ss:$0 sm:$0xff] (!%p305_p2)  ;;  %s1635_s20 = smov (!%p305_p2), 80   ;;  %s1636_s21 = smov (!%p305_p2), 72   ;;  %vm1254_vm4 = vcmask (!%p305_p2), 195584  }
   0x9   : > { %1556 = vmatprep.subr.bf16.mxu0 (!%p305_p2), %v1628_v7  ;;  %v1429_v33 = vld [vmem:[%s1842_s4] ss:$0 sm:$0xff] (!%p305_p2)  ;;  %s1637_s22 = smov (!%p305_p2), 88   ;;  %s1638_s12 = smov (!%p305_p2), 8  }
   0xa   : > { %s1639_s13 = smov (!%p305_p2), 16  }
   0xc   : > { %1598 = vrot.lane.b32.xlu1 (!%p305_p2), %v1597_v8, %s1629_s23  ;;  %1558 = vmatpush3.bf16.msra.mxu0 (!%p305_p2), %v1557_v25 }
   0xd   : > { %s1849_s10 = smov (!%p346_p3, %s1419_s10), 1  ;;  %1512 = vmatprep.subr.mxu0 %v1631_v22 }
   0xe   : > { %s1699_s11 = sshll.u32 %s1849_s10, 3 }
   0xf   : > { %s349_s14 = scalar_lea.vmem %s1838_s0, %s1699_s11  ;;  %s353_s26 = scalar_lea.vmem %s1839_s1, %s1699_s11 }
  0x10   : > { %v1705_v0 = vld [vmem:[%s349_s14] sm:$0xff]  ;;  %s1632_s14 = smov 120   ;;  %s357_s19 = scalar_lea.vmem %s1840_s2, %s1699_s11 }
  0x11   : > { %v366_v1 = vsel %vm365_vm0, %v1705_v0, 0.0  ;;  %v399_v23 = vld [vmem:[%s353_s26] sm:$0xff] }
  0x12   : > { %367 = vadd.xlane.f32.xlu0 %v366_v1  ;;  %v571_v50 = vld [vmem:[%s357_s19] sm:$0xff]  ;;  %s361_s19 = scalar_lea.vmem %s1847_s9, %s1699_s11 }
  0x7a   : > { %v1594_v9 = vpop.permute.xlu1 %1593 }
  0x7b   : > { %v1596_v10 = vunpack.i.h.bf16 %v1594_v9  ;;  %v1595_v11 = vunpack.i.l.bf16 %v1594_v9 }
  0x7d   : > { %v1560_v13 = vpack.c.bf16 %v1596_v10, %v1595_v11 }
  0x7e   : > { %v1599_v15 = vpop.permute.xlu1 %1598 }
  0x7f   : > { %v1601_v16 = vunpack.i.h.bf16 %v1599_v15  ;;  %v1600_v17 = vunpack.i.l.bf16 %v1599_v15  ;;  %1561 = vmatpush3.bf16.msra.mxu1 %v1560_v13 }
  0x80   : > { %1562 = vmatprep.subr.bf16.mxu1 %v1628_v7 }
  0x81   : > { %v1563_v19 = vpack.c.bf16 %v1601_v16, %v1600_v17 }
  0x83   : > { %1564 = vmatpush3.bf16.msra.mxu1 %v1563_v19 }
  0x84   : > { %1502 = vmatprep.subr.mxu1 %v1631_v22 }
  0x86   : > { %1500 = vmatmul.mubr.msk.f32.vlgmr.msra.gmra.mrb[0].mxu1 %vm365_vm0, %v399_v23 }
  0x87   : > { %1504 = vmatprep.mubr.msk.f32.mxu1 %vm1630_vm1, %v1631_v22 }
  0x9f   : > { %v368_v12 = vpop.xlane.xlu0 %367 }
  0xa0   : > { %v370_v14 = vmul.f32 0.03125, %v368_v12 }
  0xa2   : > { %v371_v18 = vsub.f32 %v1705_v0, %v370_v14 }
  0xa4   : > { %v372_v20 = vmul.f32 %v371_v18, %v371_v18 }
  0xa6   : > { %v373_v21 = vsel %vm365_vm0, %v372_v20, 0.0 }
  0xa7   : > { %374 = vadd.xlane.f32.xlu0 %v373_v21 }
  0xbd   : > { %495 = vrot.lane.b32.xlu0 %v1430_v26, %s1629_s23 }
 0x134   : > { %v375_v27 = vpop.xlane.xlu0 %374 }
 0x135   : > { %v376_v28 = vmul.f32 0.03125, %v375_v27 }
 0x137   : > { %v377_v29 = vadd.f32 1e-06, %v376_v28 }
 0x138   : > { %v496_v36 = vpop.permute.xlu0 %495 }
 0x139   : > { %1602 = vrsqrt.f32 %v377_v29 }
 0x143   : > { %v1603_v30 = vpop.eup %1602 }
 0x144   : > { %v379_v32 = vmul.f32 %v1603_v30, %v371_v18 }
 0x146   : > { %v386_v34 = vmul.f32 %v1428_v31, %v379_v32 }
 0x148   : > { %v393_v35 = vadd.f32 %v1429_v33, %v386_v34 }
 0x14a   : > { %1489 = vmatmul.mubr.msk.f32.vlgmr.msra.gmra.mrb[0].mxu0 %vm365_vm0, %v393_v35 }
 0x14b   : > { %1514 = vmatprep.mubr.msk.f32.mxu0 %vm1630_vm1, %v1631_v22 }
 0x159   : > { %v567_v37 = vpop.f32.mrb[0].mxu1 }
 0x15a   : > { %v1755_v38 = vadd.f32 %v567_v37, %v496_v36  ;;  %v1501_v39 = vpop.f32.mrb[1].mxu1 }
 0x15c   : > { %740 = vrot.lane.b32.xlu1 %v1755_v38, %s1632_s14  ;;  %1503 = vmatpush3.xpose.msk.msra.mxu1 %vm572_vm2, %v1755_v38 }
 0x15d   : > { %1507 = vmatprep.subr.mxu1 %v1631_v22 }
 0x160   : > { %907 = vrot.lane.b32.xlu1 %v1755_v38, %s1633_s15 }
 0x164   : > { %1074 = vrot.lane.b32.xlu1 %v1755_v38, %s1634_s16 }
 0x1ce   : > { %v741_v40 = vpop.permute.xlu1 %740 }
 0x1cf   : > { %1513 = vmatpush3.xpose.msk.msra.mxu0 %vm572_vm2, %v741_v40 }
 0x1d0   : > { %1522 = vmatprep.subr.mxu0 %v1631_v22 }
 0x1d2   : > { %v908_v44 = vpop.permute.xlu1 %907 }
 0x1d6   : > { %v1075_v45 = vpop.permute.xlu1 %1074 }
 0x21d   : > { %v475_v41 = vpop.f32.mrb[0].mxu0 }
 0x21e   : > { %v476_v42 = vadd.f32 %v1430_v26, %v475_v41  ;;  %v1490_v43 = vpop.f32.mrb[1].mxu0 }
 0x220   : > { %738 = vrot.lane.b32.xlu1 %v476_v42, %s1632_s14  ;;  %1505 = vmatmul.mubr.msk.f32.vlgmr.msra.gmra.mrb[2].mxu1 %vm572_vm2, %v476_v42  ;;  %s1640_s14 = smov 24  }
 0x221   : > { %1509 = vmatprep.mubr.msk.f32.mxu1 %vm1630_vm1, %v1631_v22 }
 0x224   : > { %905 = vrot.lane.b32.xlu1 %v476_v42, %s1633_s15 }
 0x228   : > { %1072 = vrot.lane.b32.xlu1 %v476_v42, %s1634_s16 }
 0x292   : > { %v739_v46 = vpop.permute.xlu1 %738 }
 0x293   : > { %1515 = vmatmul.mubr.msk.f32.vlgmr.msra.gmra.mrb[2].mxu0 %vm572_vm2, %v739_v46 }
 0x294   : > { %1523 = vmatpush3.xpose.msk.msra.mxu0 %vm572_vm2, %v908_v44  ;;  %1524 = vmatprep.mubr.msk.f32.mxu0 %vm1630_vm1, %v1631_v22 }
 0x295   : > { %1532 = vmatprep.subr.mxu0 %v1631_v22 }
 0x296   : > { %v906_v47 = vpop.permute.xlu1 %905 }
 0x297   : > { %1525 = vmatmul.mubr.msk.f32.vlgmr.msra.gmra.mrb[4].mxu0 %vm572_vm2, %v906_v47  ;;  %v1256_v47 = vld [vmem:[%s1845_s7] sm:$0xff] }
 0x298   : > { %1533 = vmatpush3.xpose.msk.msra.mxu0 %vm572_vm2, %v1075_v45  ;;  %1534 = vmatprep.mubr.msk.f32.mxu0 %vm1630_vm1, %v1631_v22 }
 0x299   : > { %1565 = vmatprep.subr.bf16.mxu0 %v1628_v7 }
 0x29a   : > { %v1073_v48 = vpop.permute.xlu1 %1072 }
 0x29b   : > { %1535 = vmatmul.mubr.msk.f32.vlgmr.msra.gmra.mrb[6].mxu0 %vm572_vm2, %v1073_v48  ;;  %v1257_v48 = vld [vmem:[%s1845_s7 + $0x8] sm:$0xff] }
 0x29c   : > { %1550 = vmatprep.mubr.msk.f32.mxu0 %vm1630_vm1, %v1631_v22 }
 0x2f3   : > { %v645_v49 = vpop.f32.mrb[2].mxu1 }
 0x2f4   : > { %v649_v51 = vmul.f32 0.35355338, %v645_v49  ;;  %v1506_v52 = vpop.f32.mrb[3].mxu1  ;;  %v1566_v49 = vpack.c.bf16 %v1257_v48, %v1256_v47 }
 0x2f6   : > { %v650_v53 = vadd.f32 %v649_v51, %v571_v50  ;;  %1567 = vmatpush3.bf16.msra.mxu0 %v1566_v49 }
 0x2f7   : > { %1568 = vmatprep.subr.bf16.mxu0 %v1628_v7 }
 0x2f8   : > { %v651_v54 = vsel %vm572_vm2, %v650_v53, -inf }
 0x2f9   : > { %652 = vmax.xlane.f32.xlu0 %v651_v54 }
 0x366   : > { %v812_v55 = vpop.f32.mrb[2].mxu0 }
 0x367   : > { %v816_v56 = vmul.f32 0.35355338, %v812_v55  ;;  %v1516_v57 = vpop.f32.mrb[3].mxu0 }
 0x369   : > { %v817_v58 = vadd.f32 %v816_v56, %v571_v50 }
 0x36a   : > { %v979_v59 = vpop.f32.mrb[4].mxu0 }
 0x36b   : > { %v983_v60 = vmul.f32 0.35355338, %v979_v59  ;;  %v1526_v61 = vpop.f32.mrb[5].mxu0  ;;  %v818_v62 = vsel %vm572_vm2, %v817_v58, -inf }
 0x36c   : > { %819 = vmax.xlane.f32.xlu1 %v818_v62 }
 0x36d   : > { %v984_v63 = vadd.f32 %v983_v60, %v571_v50 }
 0x36e   : > { %v1146_v1 = vpop.f32.mrb[6].mxu0 }
 0x36f   : > { %v1150_v2 = vmul.f32 0.35355338, %v1146_v1  ;;  %v1536_v3 = vpop.f32.mrb[7].mxu0  ;;  %v985_v4 = vsel %vm572_vm2, %v984_v63, -inf }
 0x370   : > { %986 = vmax.xlane.f32.xlu0 %v985_v4 }
 0x371   : > { %v1151_v5 = vadd.f32 %v1150_v2, %v571_v50  ;;  %v1259_v50 = vld [vmem:[%s1845_s7 + $0x18] sm:$0xff] }
 0x373   : > { %v1152_v6 = vsel %vm572_vm2, %v1151_v5, -inf }
 0x374   : > { %1153 = vmax.xlane.f32.xlu0 %v1152_v6 }
 0x37d   : > { %662 = vrot.lane.b32.xlu1 %v1755_v38, %s1629_s23 }
 0x386   : > { %v653_v8 = vpop.xlane.xlu0 %652 }
 0x387   : > { %v654_v9 = vsub.f32 %v650_v53, %v653_v8 }
 0x389   : > { %v655_v10 = vmul.f32 1.442695, %v654_v9 }
 0x38b   : > { %1604 = vpow2.f32 %v655_v10 }
 0x395   : > { %v1605_v11 = vpop.eup %1604 }
 0x396   : > { %v657_v12 = vsel %vm572_vm2, %v1605_v11, 0.0 }
 0x3a1   : > { %658 = vadd.xlane.f32.xlu1 %v657_v12 }
 0x3f9   : > { %v820_v13 = vpop.xlane.xlu1 %819 }
 0x3fa   : > { %v821_v14 = vsub.f32 %v817_v58, %v820_v13 }
 0x3fc   : > { %v822_v15 = vmul.f32 1.442695, %v821_v14 }
 0x3fd   : > { %v663_v16 = vpop.permute.xlu1 %662  ;;  %v987_v17 = vpop.xlane.xlu0 %986 }
 0x3fe   : > { %1606 = vpow2.f32 %v822_v15  ;;  %v988_v18 = vsub.f32 %v984_v63, %v987_v17  ;;  %1508 = vmatpush3.msra.mxu1 %v663_v16  ;;  %v1445_v63 = vld [vmem:[%s1846_s8] ss:$0 sm:$0xff] }
 0x3ff   : > { %1517 = vmatprep.subr.mxu1 %v1631_v22 }
 0x400   : > { %v989_v19 = vmul.f32 1.442695, %v988_v18 }
 0x401   : > { %v1154_v20 = vpop.xlane.xlu0 %1153 }
 0x402   : > { %1608 = vpow2.f32 %v989_v19  ;;  %v1155_v21 = vsub.f32 %v1151_v5, %v1154_v20 }
 0x404   : > { %v1156_v23 = vmul.f32 1.442695, %v1155_v21 }
 0x406   : > { %1610 = vpow2.f32 %v1156_v23 }
 0x408   : > { %v1607_v24 = vpop.eup %1606 }
 0x409   : > { %v824_v25 = vsel %vm572_vm2, %v1607_v24, 0.0 }
 0x40a   : > { %825 = vadd.xlane.f32.xlu0 %v824_v25 }
 0x40c   : > { %v1609_v26 = vpop.eup %1608 }
 0x40d   : > { %v991_v27 = vsel %vm572_vm2, %v1609_v26, 0.0 }
 0x40e   : > { %992 = vadd.xlane.f32.xlu1 %v991_v27 }
 0x410   : > { %v1611_v28 = vpop.eup %1610 }
 0x411   : > { %v1158_v29 = vsel %vm572_vm2, %v1611_v28, 0.0 }
 0x412   : > { %1159 = vadd.xlane.f32.xlu0 %v1158_v29 }
 0x41f   : > { %996 = vrot.lane.b32.xlu1 %v1755_v38, %s1635_s20 }
 0x423   : > { %1163 = vrot.lane.b32.xlu1 %v1755_v38, %s1636_s21 }
 0x428   : > { %829 = vrot.lane.b32.xlu0 %v1755_v38, %s1637_s22 }
 0x42e   : > { %v659_v30 = vpop.xlane.xlu1 %658 }
 0x42f   : > { %1612 = vrcp.f32 %v659_v30 }
 0x439   : > { %v1613_v31 = vpop.eup %1612 }
 0x43a   : > { %v661_v32 = vmul.f32 %v1613_v31, %v1605_v11 }
 0x43c   : > { %1510 = vmatmul.mubr.msk.f32.vlgmr.msra.gmra.mrb[4].mxu1 %vm572_vm2, %v661_v32 }
 0x43d   : > { %1519 = vmatprep.mubr.msk.f32.mxu1 %vm1630_vm1, %v1631_v22 }
 0x497   : > { %v826_v33 = vpop.xlane.xlu0 %825 }
 0x498   : > { %1614 = vrcp.f32 %v826_v33 }
 0x49b   : > { %v993_v34 = vpop.xlane.xlu1 %992 }
 0x49c   : > { %1616 = vrcp.f32 %v993_v34 }
 0x49f   : > { %v1160_v35 = vpop.xlane.xlu0 %1159  ;;  %v997_v39 = vpop.permute.xlu1 %996 }
 0x4a0   : > { %1618 = vrcp.f32 %v1160_v35 }
 0x4a2   : > { %v1615_v36 = vpop.eup %1614 }
 0x4a3   : > { %v828_v37 = vmul.f32 %v1615_v36, %v1607_v24  ;;  %v830_v40 = vpop.permute.xlu0 %829  ;;  %v1164_v42 = vpop.permute.xlu1 %1163 }
 0x4a4   : > { %1518 = vmatpush3.msra.mxu1 %v830_v40 }
 0x4a5   : > { %1520 = vmatmul.mubr.msk.f32.vlgmr.msra.gmra.mrb[6].mxu1 %vm572_vm2, %v828_v37  ;;  %1527 = vmatprep.subr.mxu1 %v1631_v22 }
 0x4a6   : > { %v1617_v38 = vpop.eup %1616  ;;  %1528 = vmatpush3.msra.mxu1 %v997_v39  ;;  %1529 = vmatprep.mubr.msk.f32.mxu1 %vm1630_vm1, %v1631_v22 }
 0x4a7   : > { %v995_v41 = vmul.f32 %v1617_v38, %v1609_v26  ;;  %1537 = vmatprep.subr.mxu1 %v1631_v22 }
 0x4a9   : > { %1530 = vmatmul.mubr.msk.f32.vlgmr.msra.gmra.mrb[8].mxu1 %vm572_vm2, %v995_v41 }
 0x4aa   : > { %v1619_v43 = vpop.eup %1618  ;;  %1538 = vmatpush3.msra.mxu1 %v1164_v42  ;;  %1539 = vmatprep.mubr.msk.f32.mxu1 %vm1630_vm1, %v1631_v22  ;;  %v1258_v22 = vld [vmem:[%s1845_s7 + $0x10] sm:$0xff] }
 0x4ab   : > { %v1162_v44 = vmul.f32 %v1619_v43, %v1611_v28  ;;  %v1569_v51 = vpack.c.bf16 %v1259_v50, %v1258_v22 }
 0x4ad   : > { %1540 = vmatmul.mubr.msk.f32.vlgmr.msra.gmra.mrb[10].mxu1 %vm572_vm2, %v1162_v44  ;;  %1570 = vmatpush3.bf16.msra.mxu0 %v1569_v51 }
 0x50f   : > { %v734_v45 = vpop.f32.mrb[4].mxu1 }
 0x510   : > { %v1511_v46 = vpop.f32.mrb[5].mxu1 }
 0x578   : > { %v901_v52 = vpop.f32.mrb[6].mxu1 }
 0x579   : > { %1240 = vrot.lane.b32.xlu0 %v901_v52, %s1638_s12  ;;  %v1521_v53 = vpop.f32.mrb[7].mxu1 }
 0x57c   : > { %v1068_v54 = vpop.f32.mrb[8].mxu1 }
 0x57d   : > { %1244 = vrot.lane.b32.xlu1 %v1068_v54, %s1639_s13  ;;  %v1531_v55 = vpop.f32.mrb[9].mxu1 }
 0x580   : > { %v1235_v56 = vpop.f32.mrb[10].mxu1 }
 0x581   : > { %1248 = vrot.lane.b32.xlu0 %v1235_v56, %s1640_s14  ;;  %v1541_v7 = vpop.f32.mrb[11].mxu1 }
 0x5eb   : > { %v1241_v57 = vpop.permute.xlu0 %1240 }
 0x5ec   : > { %v1251_v59 = vsel %vm572_vm2, %v734_v45, %v1241_v57 }
 0x5ef   : > { %v1245_v58 = vpop.permute.xlu1 %1244 }
 0x5f0   : > { %v1253_v60 = vsel %vm1252_vm3, %v1251_v59, %v1245_v58 }
 0x5f3   : > { %v1249_v61 = vpop.permute.xlu0 %1248 }
 0x5f4   : > { %v1255_v62 = vsel %vm1254_vm4, %v1253_v60, %v1249_v61 }
 0x5f5   : > { %1551 = vmatmul.mubr.msk.f32.vlgmr.msra.gmra.mrb[8].mxu0 %vm365_vm0, %v1255_v62 }
 0x6c8   : > { %v1336_v1 = vpop.f32.mrb[8].mxu0 }
 0x6c9   : > { %v1337_v2 = vadd.f32 %v1445_v63, %v1336_v1  ;;  %v1552_v3 = vpop.f32.mrb[9].mxu0 }
 0x6cb   : > { %v1340_v4 = vadd.f32 %v1337_v2, %v1705_v0 }
 0x6cd   : > { %1341 = vst.msk [vmem:[%s361_s19] sm:$0xff] %vm365_vm0, %v1340_v4 }
 0x6ce PF: > { %s19_s30 = sadd.s32 1, %s1626_s30  }
 0x6cf   : > { %p16_p4 = scmp.ge.s32.totalorder %s19_s30, 4  }
 0x6d1   :  { %18 = sbr.rel (!%p16_p4) target bundleno = 1 (0x1), region = 92 }

</bundles_post_ra>
